<compile_context>
chip_gen: v5e
topology: v5e:2x2
jax: 0.10.0
libtpu: 0.0.40
codegen_flags: <defaults>
</compile_context>

<pallas_src>
import math

import jax
import jax.numpy as jnp
from jax import lax
from jax.experimental import pallas as pl
from jax.experimental.pallas import tpu as pltpu

TEMP = 0.07  # SupConLoss default temperature (base_temperature == temperature)


# ------------------------------ fused kernel ------------------------------

def _disen_kernel(x1_ref, v1_ref, x2_ref, v2_ref, *rest):
    # rest = 6 (zs_enc1) + 6 (zs_enc2) + 7 (enc1) + 7 (enc2) weight refs + out ref
    zs1_p = rest[0:6]
    zs2_p = rest[6:12]
    e1_p = rest[12:19]
    e2_p = rest[19:26]
    out_ref = rest[26]            # (2,) f32 in SMEM: [loss_specific, loss_ortho]

    def mm(a_bf16, w_ref):
        # weights already bf16 at the call boundary; f32 MXU accumulation.
        return jnp.dot(a_bf16, w_ref[...], preferred_element_type=jnp.float32)

    def relu_bf16(acc_f32, b_ref):
        return jnp.maximum(acc_f32 + b_ref[...], 0.0).astype(jnp.bfloat16)

    def mlp3(x_bf16, p):
        # mlp(in, h, out, layers=2, 'relu'): Lin -> ReLU -> Lin -> ReLU -> Lin
        w1, b1, w2, b2, w3, b3 = p
        h = relu_bf16(mm(x_bf16, w1), b1)
        h = relu_bf16(mm(h, w2), b2)
        return mm(h, w3) + b3[...]

    def cond_mlp3(x_bf16, zs_bf16, p):
        # cat([x, zs], 1) @ W1 == x @ W1[:X] + zs @ W1[X:]  (weights pre-split)
        w1x, w1z, b1, w2, b2, w3, b3 = p
        h = relu_bf16(mm(x_bf16, w1x) + mm(zs_bf16, w1z), b1)
        h = relu_bf16(mm(h, w2), b2)
        return mm(h, w3) + b3[...]

    # Stack views in VMEM: rows 0..B-1 = x, rows B..2B-1 = v.  Cast once.
    xv1 = jnp.concatenate([x1_ref[...], v1_ref[...]], axis=0).astype(jnp.bfloat16)
    xv2 = jnp.concatenate([x2_ref[...], v2_ref[...]], axis=0).astype(jnp.bfloat16)

    # zsmodel outputs (frozen/.detach() in torch; weights stop-gradient'd in wrapper).
    zsx1 = mlp3(xv1, zs1_p)                       # [2B, ZS] f32
    zsx2 = mlp3(xv2, zs2_p)
    z1 = cond_mlp3(xv1, zsx1.astype(jnp.bfloat16), e1_p)   # [2B, E] f32 (condzs=True)
    z2 = cond_mlp3(xv2, zsx2.astype(jnp.bfloat16), e2_p)

    two_b = z1.shape[0]
    b = two_b // 2

    row = lax.broadcasted_iota(jnp.int32, (two_b, two_b), 0)
    col = lax.broadcasted_iota(jnp.int32, (two_b, two_b), 1)
    diag_bias = jnp.where(row == col, -1e9, 0.0)            # drop self-contrast (additive)
    pos_mask = jnp.where(jnp.abs(row - col) == b, 1.0, 0.0)  # other view, same sample

    def supcon(z, zs):
        # zjoint = cat([z, zs], 1) (apdzs & usezsx, proj=Identity), F.normalize,
        # SupConLoss with exactly one positive per anchor (so mask.sum(1) == 1).
        # TODO(synk): reference SupConLoss returns 3 values; the 2 aux values are
        # unused downstream, so only the main loss is produced.
        zj = jnp.concatenate([z, zs], axis=1)                          # [2B, E+ZS]
        zj = zj * lax.rsqrt(jnp.sum(zj * zj, axis=1, keepdims=True) + 1e-12)
        logits = lax.dot_general(zj, zj, (((1,), (1,)), ((), ())),
                                 preferred_element_type=jnp.float32) * (1.0 / TEMP)
        logits = logits + diag_bias
        logits = logits - jnp.max(logits, axis=1, keepdims=True)
        log_denom = jnp.log(jnp.sum(jnp.exp(logits), axis=1, keepdims=True))
        # one positive per row => mean_log_prob_pos = sum(mask*logits) - log_denom
        mean_log_prob_pos = jnp.sum(pos_mask * logits, axis=1, keepdims=True) - log_denom
        return -jnp.mean(mean_log_prob_pos)      # -(temp/base_temp) == -1

    def ortho(z, zs):
        # TODO(synk): exact ortho_loss is external; implemented as mean squared
        # entry of the row-normalized batch cross-correlation (norm=True).
        zn = z * lax.rsqrt(jnp.sum(z * z, axis=1, keepdims=True) + 1e-12)
        zsn = zs * lax.rsqrt(jnp.sum(zs * zs, axis=1, keepdims=True) + 1e-12)
        c = lax.dot_general(zn, zsn, (((0,), (0,)), ((), ())),
                            preferred_element_type=jnp.float32) / z.shape[0]
        return jnp.mean(c * c)

    loss_specific = supcon(z1, zsx1) + supcon(z2, zsx2)
    loss_ortho = (0.5 * (ortho(z1[:b], zsx1[:b]) + ortho(z2[:b], zsx2[:b]))
                  + 0.5 * (ortho(z1[b:], zsx1[b:]) + ortho(z2[b:], zsx2[b:])))
    out_ref[0] = loss_specific
    out_ref[1] = loss_ortho


# ------------------------------ pallas_call glue ------------------------------

def _fused_forward(kparams, x1, x2, v1, v2):
    args = (x1, v1, x2, v2, *kparams)

    two_b = 2 * x1.shape[0]
    # VMEM residency estimate: inputs/weights + activations + [2B,2B] SupCon temps.
    in_bytes = sum(int(a.size) * a.dtype.itemsize for a in args)
    act_bytes = two_b * (4 * 128 + 6 * 128) * 4            # hidden + z/zs/zjoint temps
    sup_bytes = 6 * two_b * two_b * 4                       # logits / masks / exp temps
    vmem_limit = int(min(max(2 * (in_bytes + act_bytes + sup_bytes) + (2 << 20),
                             8 << 20), 48 << 20))

    vmem = pl.BlockSpec(memory_space=pltpu.MemorySpace.VMEM)
    out = pl.pallas_call(
        _disen_kernel,
        out_shape=jax.ShapeDtypeStruct((2,), jnp.float32),
        in_specs=[vmem] * len(args),
        out_specs=pl.BlockSpec(memory_space=pltpu.MemorySpace.SMEM),
        compiler_params=pltpu.CompilerParams(vmem_limit_bytes=vmem_limit),
    )(*args)
    return out[0], out[1]


@jax.jit
def _forward_jit(kparams, x1, x2, v1, v2, lmd):
    loss_specific, loss_ortho = _fused_forward(kparams, x1, x2, v1, v2)
    loss = loss_specific + lmd * loss_ortho
    stats = {"loss": loss, "specific": loss_specific, "ortho": loss_ortho}
    return loss, stats


# ------------------------------ params / scheduler ------------------------------

def exponential_scheduler(it, start_value, end_value, n_iterations, start_iteration):
    # log-linear interpolation between start_value and end_value
    t = min(max((it - start_iteration) / float(n_iterations), 0.0), 1.0)
    return float(math.exp(math.log(start_value)
                          + t * (math.log(end_value) - math.log(start_value))))


def xavier_uniform(key, shape):
    fan_in, fan_out = shape
    limit = math.sqrt(6.0 / (fan_in + fan_out))
    return jax.random.uniform(key, shape, jnp.float32, -limit, limit)


def init_mlp(key, d_in, d_hidden, d_out):
    k1, k2, k3 = jax.random.split(key, 3)
    return (
        xavier_uniform(k1, (d_in, d_hidden)), jnp.zeros((1, d_hidden), jnp.float32),
        xavier_uniform(k2, (d_hidden, d_hidden)), jnp.zeros((1, d_hidden), jnp.float32),
        xavier_uniform(k3, (d_hidden, d_out)), jnp.zeros((1, d_out), jnp.float32),
    )


def init_disen_params(key, x1_dim, x2_dim, hidden_dim, embed_dim, zs_dim):
    ks = jax.random.split(key, 4)
    return {
        # frozen zsmodel encoders: x_dim -> zs_dim
        "zs_enc1": init_mlp(ks[0], x1_dim, hidden_dim, zs_dim),
        "zs_enc2": init_mlp(ks[1], x2_dim, hidden_dim, zs_dim),
        # condzs=True: encoders take cat([x, zsx]) -> embed_dim
        "enc1": init_mlp(ks[2], x1_dim + zs_dim, hidden_dim, embed_dim),
        "enc2": init_mlp(ks[3], x2_dim + zs_dim, hidden_dim, embed_dim),
    }


def prepare_kernel_params(params, x1_dim, x2_dim):
    """Pre-split conditional first layers and pre-cast all weights to bf16 (once)."""
    bf16 = jnp.bfloat16

    def cast_mlp(p, frozen):
        w1, b1, w2, b2, w3, b3 = p
        out = (w1.astype(bf16), b1, w2.astype(bf16), b2, w3.astype(bf16), b3)
        # frozen zsmodel (requires_grad=False / .detach() in the reference)
        # TODO(synk): a full .detach() of zsx (blocking grads into enc* through the
        # zs path) would need a custom VJP; forward values are identical.
        return tuple(lax.stop_gradient(t) for t in out) if frozen else out

    def split_cond(p, xdim):
        w1, b1, w2, b2, w3, b3 = p
        return (w1[:xdim].astype(bf16), w1[xdim:].astype(bf16), b1,
                w2.astype(bf16), b2, w3.astype(bf16), b3)

    zs1 = cast_mlp(params["zs_enc1"], frozen=True)
    zs2 = cast_mlp(params["zs_enc2"], frozen=True)
    e1 = split_cond(params["enc1"], x1_dim)
    e2 = split_cond(params["enc2"], x2_dim)
    return (*zs1, *zs2, *e1, *e2)


def disen_forward(kparams, x1, x2, v1, v2, iterations,
                  lmd_start_value=0.001, lmd_end_value=1.0,
                  lmd_n_iterations=100000, lmd_start_iteration=50000):
    assert x1.shape[0] % 8 == 0, "batch must be a multiple of 8 (tile-aligned rows)"
    lmd = exponential_scheduler(iterations, lmd_start_value, lmd_end_value,
                                lmd_n_iterations, lmd_start_iteration)
    loss, stats = _forward_jit(kparams, x1, x2, v1, v2, jnp.float32(lmd))
    # stats stay as device arrays (no host sync / .item() in the hot path)
    stats = dict(stats, lmd=lmd)
    return loss, stats


if __name__ == "__main__":
    B = 8
    X1_DIM = 16
    X2_DIM = 16
    HIDDEN = 128   # lane-aligned hidden dim
    EMBED = 64
    ZS_DIM = 64    # joint SupCon feature dim = EMBED + ZS_DIM = 128 (lane-dense)

    key = jax.random.PRNGKey(0)
    kp, k1, k2, k3, k4 = jax.random.split(key, 5)

    params = init_disen_params(kp, X1_DIM, X2_DIM, HIDDEN, EMBED, ZS_DIM)
    kparams = prepare_kernel_params(params, X1_DIM, X2_DIM)   # split + bf16, once

    x1 = jax.random.normal(k1, (B, X1_DIM), jnp.float32)
    x2 = jax.random.normal(k2, (B, X2_DIM), jnp.float32)
    v1 = jax.random.normal(k3, (B, X1_DIM), jnp.float32)
    v2 = jax.random.normal(k4, (B, X2_DIM), jnp.float32)

    loss, stats = disen_forward(kparams, x1, x2, v1, v2, iterations=1)
    loss = jax.block_until_ready(loss)
    assert bool(jnp.isfinite(loss))
    print("KERNEL_OK")
</pallas_src>

<mosaic_0001>
module attributes {stable_mosaic.version = 11 : i64} {
  func.func @_disen_kernel(%arg0: memref<8x16xf32, #tpu.memory_space<vmem>>, %arg1: memref<8x16xf32, #tpu.memory_space<vmem>>, %arg2: memref<8x16xf32, #tpu.memory_space<vmem>>, %arg3: memref<8x16xf32, #tpu.memory_space<vmem>>, %arg4: memref<16x128xbf16, #tpu.memory_space<vmem>>, %arg5: memref<1x128xf32, #tpu.memory_space<vmem>>, %arg6: memref<128x128xbf16, #tpu.memory_space<vmem>>, %arg7: memref<1x128xf32, #tpu.memory_space<vmem>>, %arg8: memref<128x64xbf16, #tpu.memory_space<vmem>>, %arg9: memref<1x64xf32, #tpu.memory_space<vmem>>, %arg10: memref<16x128xbf16, #tpu.memory_space<vmem>>, %arg11: memref<1x128xf32, #tpu.memory_space<vmem>>, %arg12: memref<128x128xbf16, #tpu.memory_space<vmem>>, %arg13: memref<1x128xf32, #tpu.memory_space<vmem>>, %arg14: memref<128x64xbf16, #tpu.memory_space<vmem>>, %arg15: memref<1x64xf32, #tpu.memory_space<vmem>>, %arg16: memref<16x128xbf16, #tpu.memory_space<vmem>>, %arg17: memref<64x128xbf16, #tpu.memory_space<vmem>>, %arg18: memref<1x128xf32, #tpu.memory_space<vmem>>, %arg19: memref<128x128xbf16, #tpu.memory_space<vmem>>, %arg20: memref<1x128xf32, #tpu.memory_space<vmem>>, %arg21: memref<128x64xbf16, #tpu.memory_space<vmem>>, %arg22: memref<1x64xf32, #tpu.memory_space<vmem>>, %arg23: memref<16x128xbf16, #tpu.memory_space<vmem>>, %arg24: memref<64x128xbf16, #tpu.memory_space<vmem>>, %arg25: memref<1x128xf32, #tpu.memory_space<vmem>>, %arg26: memref<128x128xbf16, #tpu.memory_space<vmem>>, %arg27: memref<1x128xf32, #tpu.memory_space<vmem>>, %arg28: memref<128x64xbf16, #tpu.memory_space<vmem>>, %arg29: memref<1x64xf32, #tpu.memory_space<vmem>>, %arg30: memref<2xf32, #tpu.memory_space<smem>>) attributes {dimension_semantics = [], scalar_prefetch = 0 : i64, scratch_operands = 0 : i64, tpu.core_type = #tpu.core_type<tc>} {
    %c0 = arith.constant 0 : index
    %c0_0 = arith.constant 0 : index
    %0 = vector.load %arg0[%c0, %c0_0] : memref<8x16xf32, #tpu.memory_space<vmem>>, vector<8x16xf32>
    %c0_1 = arith.constant 0 : index
    %c0_2 = arith.constant 0 : index
    %1 = vector.load %arg1[%c0_1, %c0_2] : memref<8x16xf32, #tpu.memory_space<vmem>>, vector<8x16xf32>
    %2 = tpu.concatenate %0, %1 in 0 : vector<8x16xf32>, vector<8x16xf32> -> vector<16x16xf32>
    %3 = arith.truncf %2 : vector<16x16xf32> to vector<16x16xbf16>
    %c0_3 = arith.constant 0 : index
    %c0_4 = arith.constant 0 : index
    %4 = vector.load %arg2[%c0_3, %c0_4] : memref<8x16xf32, #tpu.memory_space<vmem>>, vector<8x16xf32>
    %c0_5 = arith.constant 0 : index
    %c0_6 = arith.constant 0 : index
    %5 = vector.load %arg3[%c0_5, %c0_6] : memref<8x16xf32, #tpu.memory_space<vmem>>, vector<8x16xf32>
    %6 = tpu.concatenate %4, %5 in 0 : vector<8x16xf32>, vector<8x16xf32> -> vector<16x16xf32>
    %7 = arith.truncf %6 : vector<16x16xf32> to vector<16x16xbf16>
    %c0_7 = arith.constant 0 : index
    %c0_8 = arith.constant 0 : index
    %8 = vector.load %arg4[%c0_7, %c0_8] : memref<16x128xbf16, #tpu.memory_space<vmem>>, vector<16x128xbf16>
    %cst = arith.constant dense<0.000000e+00> : vector<16x128xf32>
    %9 = tpu.matmul %3, %8, %cst {dimension_numbers = #tpu.dot_dimension_numbers<[1], [0], [0], [1], [0, 0, 1, 1], [], []>} : vector<16x16xbf16>, vector<16x128xbf16>, vector<16x128xf32> -> vector<16x128xf32>
    %c0_9 = arith.constant 0 : index
    %c0_10 = arith.constant 0 : index
    %10 = vector.load %arg5[%c0_9, %c0_10] : memref<1x128xf32, #tpu.memory_space<vmem>>, vector<1x128xf32>
    %11 = vector.broadcast %10 : vector<1x128xf32> to vector<16x128xf32>
    %12 = arith.addf %9, %11 : vector<16x128xf32>
    %cst_11 = arith.constant 0.000000e+00 : f32
    %13 = vector.broadcast %cst_11 : f32 to vector<16x128xf32>
    %14 = arith.maximumf %12, %13 : vector<16x128xf32>
    %15 = arith.truncf %14 : vector<16x128xf32> to vector<16x128xbf16>
    %c0_12 = arith.constant 0 : index
    %c0_13 = arith.constant 0 : index
    %16 = vector.load %arg6[%c0_12, %c0_13] : memref<128x128xbf16, #tpu.memory_space<vmem>>, vector<128x128xbf16>
    %cst_14 = arith.constant dense<0.000000e+00> : vector<16x128xf32>
    %17 = tpu.matmul %15, %16, %cst_14 {dimension_numbers = #tpu.dot_dimension_numbers<[1], [0], [0], [1], [0, 0, 1, 1], [], []>} : vector<16x128xbf16>, vector<128x128xbf16>, vector<16x128xf32> -> vector<16x128xf32>
    %c0_15 = arith.constant 0 : index
    %c0_16 = arith.constant 0 : index
    %18 = vector.load %arg7[%c0_15, %c0_16] : memref<1x128xf32, #tpu.memory_space<vmem>>, vector<1x128xf32>
    %19 = vector.broadcast %18 : vector<1x128xf32> to vector<16x128xf32>
    %20 = arith.addf %17, %19 : vector<16x128xf32>
    %cst_17 = arith.constant 0.000000e+00 : f32
    %21 = vector.broadcast %cst_17 : f32 to vector<16x128xf32>
    %22 = arith.maximumf %20, %21 : vector<16x128xf32>
    %23 = arith.truncf %22 : vector<16x128xf32> to vector<16x128xbf16>
    %c0_18 = arith.constant 0 : index
    %c0_19 = arith.constant 0 : index
    %24 = vector.load %arg8[%c0_18, %c0_19] : memref<128x64xbf16, #tpu.memory_space<vmem>>, vector<128x64xbf16>
    %cst_20 = arith.constant dense<0.000000e+00> : vector<16x64xf32>
    %25 = tpu.matmul %23, %24, %cst_20 {dimension_numbers = #tpu.dot_dimension_numbers<[1], [0], [0], [1], [0, 0, 1, 1], [], []>} : vector<16x128xbf16>, vector<128x64xbf16>, vector<16x64xf32> -> vector<16x64xf32>
    %c0_21 = arith.constant 0 : index
    %c0_22 = arith.constant 0 : index
    %26 = vector.load %arg9[%c0_21, %c0_22] : memref<1x64xf32, #tpu.memory_space<vmem>>, vector<1x64xf32>
    %27 = vector.broadcast %26 : vector<1x64xf32> to vector<16x64xf32>
    %28 = arith.addf %25, %27 : vector<16x64xf32>
    %c0_23 = arith.constant 0 : index
    %c0_24 = arith.constant 0 : index
    %29 = vector.load %arg10[%c0_23, %c0_24] : memref<16x128xbf16, #tpu.memory_space<vmem>>, vector<16x128xbf16>
    %cst_25 = arith.constant dense<0.000000e+00> : vector<16x128xf32>
    %30 = tpu.matmul %7, %29, %cst_25 {dimension_numbers = #tpu.dot_dimension_numbers<[1], [0], [0], [1], [0, 0, 1, 1], [], []>} : vector<16x16xbf16>, vector<16x128xbf16>, vector<16x128xf32> -> vector<16x128xf32>
    %c0_26 = arith.constant 0 : index
    %c0_27 = arith.constant 0 : index
    %31 = vector.load %arg11[%c0_26, %c0_27] : memref<1x128xf32, #tpu.memory_space<vmem>>, vector<1x128xf32>
    %32 = vector.broadcast %31 : vector<1x128xf32> to vector<16x128xf32>
    %33 = arith.addf %30, %32 : vector<16x128xf32>
    %cst_28 = arith.constant 0.000000e+00 : f32
    %34 = vector.broadcast %cst_28 : f32 to vector<16x128xf32>
    %35 = arith.maximumf %33, %34 : vector<16x128xf32>
    %36 = arith.truncf %35 : vector<16x128xf32> to vector<16x128xbf16>
    %c0_29 = arith.constant 0 : index
    %c0_30 = arith.constant 0 : index
    %37 = vector.load %arg12[%c0_29, %c0_30] : memref<128x128xbf16, #tpu.memory_space<vmem>>, vector<128x128xbf16>
    %cst_31 = arith.constant dense<0.000000e+00> : vector<16x128xf32>
    %38 = tpu.matmul %36, %37, %cst_31 {dimension_numbers = #tpu.dot_dimension_numbers<[1], [0], [0], [1], [0, 0, 1, 1], [], []>} : vector<16x128xbf16>, vector<128x128xbf16>, vector<16x128xf32> -> vector<16x128xf32>
    %c0_32 = arith.constant 0 : index
    %c0_33 = arith.constant 0 : index
    %39 = vector.load %arg13[%c0_32, %c0_33] : memref<1x128xf32, #tpu.memory_space<vmem>>, vector<1x128xf32>
    %40 = vector.broadcast %39 : vector<1x128xf32> to vector<16x128xf32>
    %41 = arith.addf %38, %40 : vector<16x128xf32>
    %cst_34 = arith.constant 0.000000e+00 : f32
    %42 = vector.broadcast %cst_34 : f32 to vector<16x128xf32>
    %43 = arith.maximumf %41, %42 : vector<16x128xf32>
    %44 = arith.truncf %43 : vector<16x128xf32> to vector<16x128xbf16>
    %c0_35 = arith.constant 0 : index
    %c0_36 = arith.constant 0 : index
    %45 = vector.load %arg14[%c0_35, %c0_36] : memref<128x64xbf16, #tpu.memory_space<vmem>>, vector<128x64xbf16>
    %cst_37 = arith.constant dense<0.000000e+00> : vector<16x64xf32>
    %46 = tpu.matmul %44, %45, %cst_37 {dimension_numbers = #tpu.dot_dimension_numbers<[1], [0], [0], [1], [0, 0, 1, 1], [], []>} : vector<16x128xbf16>, vector<128x64xbf16>, vector<16x64xf32> -> vector<16x64xf32>
    %c0_38 = arith.constant 0 : index
    %c0_39 = arith.constant 0 : index
    %47 = vector.load %arg15[%c0_38, %c0_39] : memref<1x64xf32, #tpu.memory_space<vmem>>, vector<1x64xf32>
    %48 = vector.broadcast %47 : vector<1x64xf32> to vector<16x64xf32>
    %49 = arith.addf %46, %48 : vector<16x64xf32>
    %50 = arith.truncf %28 : vector<16x64xf32> to vector<16x64xbf16>
    %c0_40 = arith.constant 0 : index
    %c0_41 = arith.constant 0 : index
    %51 = vector.load %arg16[%c0_40, %c0_41] : memref<16x128xbf16, #tpu.memory_space<vmem>>, vector<16x128xbf16>
    %cst_42 = arith.constant dense<0.000000e+00> : vector<16x128xf32>
    %52 = tpu.matmul %3, %51, %cst_42 {dimension_numbers = #tpu.dot_dimension_numbers<[1], [0], [0], [1], [0, 0, 1, 1], [], []>} : vector<16x16xbf16>, vector<16x128xbf16>, vector<16x128xf32> -> vector<16x128xf32>
    %c0_43 = arith.constant 0 : index
    %c0_44 = arith.constant 0 : index
    %53 = vector.load %arg17[%c0_43, %c0_44] : memref<64x128xbf16, #tpu.memory_space<vmem>>, vector<64x128xbf16>
    %cst_45 = arith.constant dense<0.000000e+00> : vector<16x128xf32>
    %54 = tpu.matmul %50, %53, %cst_45 {dimension_numbers = #tpu.dot_dimension_numbers<[1], [0], [0], [1], [0, 0, 1, 1], [], []>} : vector<16x64xbf16>, vector<64x128xbf16>, vector<16x128xf32> -> vector<16x128xf32>
    %55 = arith.addf %52, %54 : vector<16x128xf32>
    %c0_46 = arith.constant 0 : index
    %c0_47 = arith.constant 0 : index
    %56 = vector.load %arg18[%c0_46, %c0_47] : memref<1x128xf32, #tpu.memory_space<vmem>>, vector<1x128xf32>
    %57 = vector.broadcast %56 : vector<1x128xf32> to vector<16x128xf32>
    %58 = arith.addf %55, %57 : vector<16x128xf32>
    %cst_48 = arith.constant 0.000000e+00 : f32
    %59 = vector.broadcast %cst_48 : f32 to vector<16x128xf32>
    %60 = arith.maximumf %58, %59 : vector<16x128xf32>
    %61 = arith.truncf %60 : vector<16x128xf32> to vector<16x128xbf16>
    %c0_49 = arith.constant 0 : index
    %c0_50 = arith.constant 0 : index
    %62 = vector.load %arg19[%c0_49, %c0_50] : memref<128x128xbf16, #tpu.memory_space<vmem>>, vector<128x128xbf16>
    %cst_51 = arith.constant dense<0.000000e+00> : vector<16x128xf32>
    %63 = tpu.matmul %61, %62, %cst_51 {dimension_numbers = #tpu.dot_dimension_numbers<[1], [0], [0], [1], [0, 0, 1, 1], [], []>} : vector<16x128xbf16>, vector<128x128xbf16>, vector<16x128xf32> -> vector<16x128xf32>
    %c0_52 = arith.constant 0 : index
    %c0_53 = arith.constant 0 : index
    %64 = vector.load %arg20[%c0_52, %c0_53] : memref<1x128xf32, #tpu.memory_space<vmem>>, vector<1x128xf32>
    %65 = vector.broadcast %64 : vector<1x128xf32> to vector<16x128xf32>
    %66 = arith.addf %63, %65 : vector<16x128xf32>
    %cst_54 = arith.constant 0.000000e+00 : f32
    %67 = vector.broadcast %cst_54 : f32 to vector<16x128xf32>
    %68 = arith.maximumf %66, %67 : vector<16x128xf32>
    %69 = arith.truncf %68 : vector<16x128xf32> to vector<16x128xbf16>
    %c0_55 = arith.constant 0 : index
    %c0_56 = arith.constant 0 : index
    %70 = vector.load %arg21[%c0_55, %c0_56] : memref<128x64xbf16, #tpu.memory_space<vmem>>, vector<128x64xbf16>
    %cst_57 = arith.constant dense<0.000000e+00> : vector<16x64xf32>
    %71 = tpu.matmul %69, %70, %cst_57 {dimension_numbers = #tpu.dot_dimension_numbers<[1], [0], [0], [1], [0, 0, 1, 1], [], []>} : vector<16x128xbf16>, vector<128x64xbf16>, vector<16x64xf32> -> vector<16x64xf32>
    %c0_58 = arith.constant 0 : index
    %c0_59 = arith.constant 0 : index
    %72 = vector.load %arg22[%c0_58, %c0_59] : memref<1x64xf32, #tpu.memory_space<vmem>>, vector<1x64xf32>
    %73 = vector.broadcast %72 : vector<1x64xf32> to vector<16x64xf32>
    %74 = arith.addf %71, %73 : vector<16x64xf32>
    %75 = arith.truncf %49 : vector<16x64xf32> to vector<16x64xbf16>
    %c0_60 = arith.constant 0 : index
    %c0_61 = arith.constant 0 : index
    %76 = vector.load %arg23[%c0_60, %c0_61] : memref<16x128xbf16, #tpu.memory_space<vmem>>, vector<16x128xbf16>
    %cst_62 = arith.constant dense<0.000000e+00> : vector<16x128xf32>
    %77 = tpu.matmul %7, %76, %cst_62 {dimension_numbers = #tpu.dot_dimension_numbers<[1], [0], [0], [1], [0, 0, 1, 1], [], []>} : vector<16x16xbf16>, vector<16x128xbf16>, vector<16x128xf32> -> vector<16x128xf32>
    %c0_63 = arith.constant 0 : index
    %c0_64 = arith.constant 0 : index
    %78 = vector.load %arg24[%c0_63, %c0_64] : memref<64x128xbf16, #tpu.memory_space<vmem>>, vector<64x128xbf16>
    %cst_65 = arith.constant dense<0.000000e+00> : vector<16x128xf32>
    %79 = tpu.matmul %75, %78, %cst_65 {dimension_numbers = #tpu.dot_dimension_numbers<[1], [0], [0], [1], [0, 0, 1, 1], [], []>} : vector<16x64xbf16>, vector<64x128xbf16>, vector<16x128xf32> -> vector<16x128xf32>
    %80 = arith.addf %77, %79 : vector<16x128xf32>
    %c0_66 = arith.constant 0 : index
    %c0_67 = arith.constant 0 : index
    %81 = vector.load %arg25[%c0_66, %c0_67] : memref<1x128xf32, #tpu.memory_space<vmem>>, vector<1x128xf32>
    %82 = vector.broadcast %81 : vector<1x128xf32> to vector<16x128xf32>
    %83 = arith.addf %80, %82 : vector<16x128xf32>
    %cst_68 = arith.constant 0.000000e+00 : f32
    %84 = vector.broadcast %cst_68 : f32 to vector<16x128xf32>
    %85 = arith.maximumf %83, %84 : vector<16x128xf32>
    %86 = arith.truncf %85 : vector<16x128xf32> to vector<16x128xbf16>
    %c0_69 = arith.constant 0 : index
    %c0_70 = arith.constant 0 : index
    %87 = vector.load %arg26[%c0_69, %c0_70] : memref<128x128xbf16, #tpu.memory_space<vmem>>, vector<128x128xbf16>
    %cst_71 = arith.constant dense<0.000000e+00> : vector<16x128xf32>
    %88 = tpu.matmul %86, %87, %cst_71 {dimension_numbers = #tpu.dot_dimension_numbers<[1], [0], [0], [1], [0, 0, 1, 1], [], []>} : vector<16x128xbf16>, vector<128x128xbf16>, vector<16x128xf32> -> vector<16x128xf32>
    %c0_72 = arith.constant 0 : index
    %c0_73 = arith.constant 0 : index
    %89 = vector.load %arg27[%c0_72, %c0_73] : memref<1x128xf32, #tpu.memory_space<vmem>>, vector<1x128xf32>
    %90 = vector.broadcast %89 : vector<1x128xf32> to vector<16x128xf32>
    %91 = arith.addf %88, %90 : vector<16x128xf32>
    %cst_74 = arith.constant 0.000000e+00 : f32
    %92 = vector.broadcast %cst_74 : f32 to vector<16x128xf32>
    %93 = arith.maximumf %91, %92 : vector<16x128xf32>
    %94 = arith.truncf %93 : vector<16x128xf32> to vector<16x128xbf16>
    %c0_75 = arith.constant 0 : index
    %c0_76 = arith.constant 0 : index
    %95 = vector.load %arg28[%c0_75, %c0_76] : memref<128x64xbf16, #tpu.memory_space<vmem>>, vector<128x64xbf16>
    %cst_77 = arith.constant dense<0.000000e+00> : vector<16x64xf32>
    %96 = tpu.matmul %94, %95, %cst_77 {dimension_numbers = #tpu.dot_dimension_numbers<[1], [0], [0], [1], [0, 0, 1, 1], [], []>} : vector<16x128xbf16>, vector<128x64xbf16>, vector<16x64xf32> -> vector<16x64xf32>
    %c0_78 = arith.constant 0 : index
    %c0_79 = arith.constant 0 : index
    %97 = vector.load %arg29[%c0_78, %c0_79] : memref<1x64xf32, #tpu.memory_space<vmem>>, vector<1x64xf32>
    %98 = vector.broadcast %97 : vector<1x64xf32> to vector<16x64xf32>
    %99 = arith.addf %96, %98 : vector<16x64xf32>
    %100 = tpu.iota {dimensions = array<i32: 0>} : vector<16x16xi32>
    %101 = tpu.iota {dimensions = array<i32: 1>} : vector<16x16xi32>
    %102 = arith.cmpi eq, %100, %101 : vector<16x16xi32>
    %cst_80 = arith.constant -1.000000e+09 : f32
    %cst_81 = arith.constant 0.000000e+00 : f32
    %103 = vector.broadcast %cst_80 : f32 to vector<16x16xf32>
    %104 = vector.broadcast %cst_81 : f32 to vector<16x16xf32>
    %105 = arith.select %102, %103, %104 : vector<16x16xi1>, vector<16x16xf32>
    %106 = arith.subi %100, %101 : vector<16x16xi32>
    %107 = math.absi %106 : vector<16x16xi32>
    %c8_i32 = arith.constant 8 : i32
    %108 = vector.broadcast %c8_i32 : i32 to vector<16x16xi32>
    %109 = arith.cmpi eq, %107, %108 : vector<16x16xi32>
    %cst_82 = arith.constant 1.000000e+00 : f32
    %cst_83 = arith.constant 0.000000e+00 : f32
    %110 = vector.broadcast %cst_82 : f32 to vector<16x16xf32>
    %111 = vector.broadcast %cst_83 : f32 to vector<16x16xf32>
    %112 = arith.select %109, %110, %111 : vector<16x16xi1>, vector<16x16xf32>
    %113 = tpu.concatenate %74, %28 in 1 : vector<16x64xf32>, vector<16x64xf32> -> vector<16x128xf32>
    %114 = arith.mulf %113, %113 : vector<16x128xf32>
    %cst_84 = arith.constant dense<0.000000e+00> : vector<16xf32>
    %115 = vector.multi_reduction <add>, %114, %cst_84 [1] : vector<16x128xf32> to vector<16xf32>
    %116 = vector.shape_cast %115 : vector<16xf32> to vector<16x1xf32>
    %cst_85 = arith.constant 9.99999996E-13 : f32
    %117 = vector.broadcast %cst_85 : f32 to vector<16x1xf32>
    %118 = arith.addf %116, %117 : vector<16x1xf32>
    %119 = math.rsqrt %118 : vector<16x1xf32>
    %120 = vector.broadcast %119 : vector<16x1xf32> to vector<16x128xf32>
    %121 = arith.mulf %113, %120 : vector<16x128xf32>
    %cst_86 = arith.constant dense<0.000000e+00> : vector<16x16xf32>
    %122 = tpu.matmul %121, %121, %cst_86 {dimension_numbers = #tpu.dot_dimension_numbers<[1], [1], [0], [0], [0, 0, 1, 0], [], []>} : vector<16x128xf32>, vector<16x128xf32>, vector<16x16xf32> -> vector<16x16xf32>
    %cst_87 = arith.constant 14.2857141 : f32
    %123 = vector.broadcast %cst_87 : f32 to vector<16x16xf32>
    %124 = arith.mulf %122, %123 : vector<16x16xf32>
    %125 = arith.addf %124, %105 : vector<16x16xf32>
    %cst_88 = arith.constant dense<0xFF800000> : vector<16xf32>
    %126 = vector.multi_reduction <maximumf>, %125, %cst_88 [1] : vector<16x16xf32> to vector<16xf32>
    %127 = vector.shape_cast %126 : vector<16xf32> to vector<16x1xf32>
    %128 = vector.broadcast %127 : vector<16x1xf32> to vector<16x16xf32>
    %129 = arith.subf %125, %128 : vector<16x16xf32>
    %130 = math.exp %129 : vector<16x16xf32>
    %cst_89 = arith.constant dense<0.000000e+00> : vector<16xf32>
    %131 = vector.multi_reduction <add>, %130, %cst_89 [1] : vector<16x16xf32> to vector<16xf32>
    %132 = vector.shape_cast %131 : vector<16xf32> to vector<16x1xf32>
    %133 = math.log %132 : vector<16x1xf32>
    %134 = arith.mulf %112, %129 : vector<16x16xf32>
    %cst_90 = arith.constant dense<0.000000e+00> : vector<16xf32>
    %135 = vector.multi_reduction <add>, %134, %cst_90 [1] : vector<16x16xf32> to vector<16xf32>
    %136 = vector.shape_cast %135 : vector<16xf32> to vector<16x1xf32>
    %137 = arith.subf %136, %133 : vector<16x1xf32>
    %138 = vector.shape_cast %137 : vector<16x1xf32> to vector<1x16x1xf32>
    %cst_91 = arith.constant dense<0.000000e+00> : vector<1xf32>
    %139 = vector.multi_reduction <add>, %138, %cst_91 [1, 2] : vector<1x16x1xf32> to vector<1xf32>
    %140 = vector.shape_cast %139 : vector<1xf32> to vector<1x1x1xf32>
    %141 = vector.extract %140[0, 0, 0] : f32 from vector<1x1x1xf32>
    %cst_92 = arith.constant 1.600000e+01 : f32
    %142 = arith.divf %141, %cst_92 : f32
    %cst_93 = arith.constant 0.000000e+00 : f32
    %143 = arith.subf %cst_93, %142 : f32
    %144 = tpu.concatenate %99, %49 in 1 : vector<16x64xf32>, vector<16x64xf32> -> vector<16x128xf32>
    %145 = arith.mulf %144, %144 : vector<16x128xf32>
    %cst_94 = arith.constant dense<0.000000e+00> : vector<16xf32>
    %146 = vector.multi_reduction <add>, %145, %cst_94 [1] : vector<16x128xf32> to vector<16xf32>
    %147 = vector.shape_cast %146 : vector<16xf32> to vector<16x1xf32>
    %cst_95 = arith.constant 9.99999996E-13 : f32
    %148 = vector.broadcast %cst_95 : f32 to vector<16x1xf32>
    %149 = arith.addf %147, %148 : vector<16x1xf32>
    %150 = math.rsqrt %149 : vector<16x1xf32>
    %151 = vector.broadcast %150 : vector<16x1xf32> to vector<16x128xf32>
    %152 = arith.mulf %144, %151 : vector<16x128xf32>
    %cst_96 = arith.constant dense<0.000000e+00> : vector<16x16xf32>
    %153 = tpu.matmul %152, %152, %cst_96 {dimension_numbers = #tpu.dot_dimension_numbers<[1], [1], [0], [0], [0, 0, 1, 0], [], []>} : vector<16x128xf32>, vector<16x128xf32>, vector<16x16xf32> -> vector<16x16xf32>
    %cst_97 = arith.constant 14.2857141 : f32
    %154 = vector.broadcast %cst_97 : f32 to vector<16x16xf32>
    %155 = arith.mulf %153, %154 : vector<16x16xf32>
    %156 = arith.addf %155, %105 : vector<16x16xf32>
    %cst_98 = arith.constant dense<0xFF800000> : vector<16xf32>
    %157 = vector.multi_reduction <maximumf>, %156, %cst_98 [1] : vector<16x16xf32> to vector<16xf32>
    %158 = vector.shape_cast %157 : vector<16xf32> to vector<16x1xf32>
    %159 = vector.broadcast %158 : vector<16x1xf32> to vector<16x16xf32>
    %160 = arith.subf %156, %159 : vector<16x16xf32>
    %161 = math.exp %160 : vector<16x16xf32>
    %cst_99 = arith.constant dense<0.000000e+00> : vector<16xf32>
    %162 = vector.multi_reduction <add>, %161, %cst_99 [1] : vector<16x16xf32> to vector<16xf32>
    %163 = vector.shape_cast %162 : vector<16xf32> to vector<16x1xf32>
    %164 = math.log %163 : vector<16x1xf32>
    %165 = arith.mulf %112, %160 : vector<16x16xf32>
    %cst_100 = arith.constant dense<0.000000e+00> : vector<16xf32>
    %166 = vector.multi_reduction <add>, %165, %cst_100 [1] : vector<16x16xf32> to vector<16xf32>
    %167 = vector.shape_cast %166 : vector<16xf32> to vector<16x1xf32>
    %168 = arith.subf %167, %164 : vector<16x1xf32>
    %169 = vector.shape_cast %168 : vector<16x1xf32> to vector<1x16x1xf32>
    %cst_101 = arith.constant dense<0.000000e+00> : vector<1xf32>
    %170 = vector.multi_reduction <add>, %169, %cst_101 [1, 2] : vector<1x16x1xf32> to vector<1xf32>
    %171 = vector.shape_cast %170 : vector<1xf32> to vector<1x1x1xf32>
    %172 = vector.extract %171[0, 0, 0] : f32 from vector<1x1x1xf32>
    %cst_102 = arith.constant 1.600000e+01 : f32
    %173 = arith.divf %172, %cst_102 : f32
    %cst_103 = arith.constant 0.000000e+00 : f32
    %174 = arith.subf %cst_103, %173 : f32
    %175 = arith.addf %143, %174 : f32
    %176 = vector.extract_strided_slice %74 {offsets = [0, 0], sizes = [8, 64], strides = [1, 1]} : vector<16x64xf32> to vector<8x64xf32>
    %177 = vector.extract_strided_slice %28 {offsets = [0, 0], sizes = [8, 64], strides = [1, 1]} : vector<16x64xf32> to vector<8x64xf32>
    %178 = arith.mulf %176, %176 : vector<8x64xf32>
    %cst_104 = arith.constant dense<0.000000e+00> : vector<8xf32>
    %179 = vector.multi_reduction <add>, %178, %cst_104 [1] : vector<8x64xf32> to vector<8xf32>
    %180 = vector.shape_cast %179 : vector<8xf32> to vector<8x1xf32>
    %cst_105 = arith.constant 9.99999996E-13 : f32
    %181 = vector.broadcast %cst_105 : f32 to vector<8x1xf32>
    %182 = arith.addf %180, %181 : vector<8x1xf32>
    %183 = math.rsqrt %182 : vector<8x1xf32>
    %184 = vector.broadcast %183 : vector<8x1xf32> to vector<8x64xf32>
    %185 = arith.mulf %176, %184 : vector<8x64xf32>
    %186 = arith.mulf %177, %177 : vector<8x64xf32>
    %cst_106 = arith.constant dense<0.000000e+00> : vector<8xf32>
    %187 = vector.multi_reduction <add>, %186, %cst_106 [1] : vector<8x64xf32> to vector<8xf32>
    %188 = vector.shape_cast %187 : vector<8xf32> to vector<8x1xf32>
    %cst_107 = arith.constant 9.99999996E-13 : f32
    %189 = vector.broadcast %cst_107 : f32 to vector<8x1xf32>
    %190 = arith.addf %188, %189 : vector<8x1xf32>
    %191 = math.rsqrt %190 : vector<8x1xf32>
    %192 = vector.broadcast %191 : vector<8x1xf32> to vector<8x64xf32>
    %193 = arith.mulf %177, %192 : vector<8x64xf32>
    %cst_108 = arith.constant dense<0.000000e+00> : vector<64x64xf32>
    %194 = tpu.matmul %185, %193, %cst_108 {dimension_numbers = #tpu.dot_dimension_numbers<[0], [0], [1], [1], [0, 1, 1, 1], [], []>} : vector<8x64xf32>, vector<8x64xf32>, vector<64x64xf32> -> vector<64x64xf32>
    %cst_109 = arith.constant 8.000000e+00 : f32
    %195 = vector.broadcast %cst_109 : f32 to vector<64x64xf32>
    %196 = arith.divf %194, %195 : vector<64x64xf32>
    %197 = arith.mulf %196, %196 : vector<64x64xf32>
    %198 = vector.shape_cast %197 : vector<64x64xf32> to vector<1x64x64xf32>
    %cst_110 = arith.constant dense<0.000000e+00> : vector<1xf32>
    %199 = vector.multi_reduction <add>, %198, %cst_110 [1, 2] : vector<1x64x64xf32> to vector<1xf32>
    %200 = vector.shape_cast %199 : vector<1xf32> to vector<1x1x1xf32>
    %201 = vector.extract %200[0, 0, 0] : f32 from vector<1x1x1xf32>
    %cst_111 = arith.constant 4.096000e+03 : f32
    %202 = arith.divf %201, %cst_111 : f32
    %203 = vector.extract_strided_slice %99 {offsets = [0, 0], sizes = [8, 64], strides = [1, 1]} : vector<16x64xf32> to vector<8x64xf32>
    %204 = vector.extract_strided_slice %49 {offsets = [0, 0], sizes = [8, 64], strides = [1, 1]} : vector<16x64xf32> to vector<8x64xf32>
    %205 = arith.mulf %203, %203 : vector<8x64xf32>
    %cst_112 = arith.constant dense<0.000000e+00> : vector<8xf32>
    %206 = vector.multi_reduction <add>, %205, %cst_112 [1] : vector<8x64xf32> to vector<8xf32>
    %207 = vector.shape_cast %206 : vector<8xf32> to vector<8x1xf32>
    %cst_113 = arith.constant 9.99999996E-13 : f32
    %208 = vector.broadcast %cst_113 : f32 to vector<8x1xf32>
    %209 = arith.addf %207, %208 : vector<8x1xf32>
    %210 = math.rsqrt %209 : vector<8x1xf32>
    %211 = vector.broadcast %210 : vector<8x1xf32> to vector<8x64xf32>
    %212 = arith.mulf %203, %211 : vector<8x64xf32>
    %213 = arith.mulf %204, %204 : vector<8x64xf32>
    %cst_114 = arith.constant dense<0.000000e+00> : vector<8xf32>
    %214 = vector.multi_reduction <add>, %213, %cst_114 [1] : vector<8x64xf32> to vector<8xf32>
    %215 = vector.shape_cast %214 : vector<8xf32> to vector<8x1xf32>
    %cst_115 = arith.constant 9.99999996E-13 : f32
    %216 = vector.broadcast %cst_115 : f32 to vector<8x1xf32>
    %217 = arith.addf %215, %216 : vector<8x1xf32>
    %218 = math.rsqrt %217 : vector<8x1xf32>
    %219 = vector.broadcast %218 : vector<8x1xf32> to vector<8x64xf32>
    %220 = arith.mulf %204, %219 : vector<8x64xf32>
    %cst_116 = arith.constant dense<0.000000e+00> : vector<64x64xf32>
    %221 = tpu.matmul %212, %220, %cst_116 {dimension_numbers = #tpu.dot_dimension_numbers<[0], [0], [1], [1], [0, 1, 1, 1], [], []>} : vector<8x64xf32>, vector<8x64xf32>, vector<64x64xf32> -> vector<64x64xf32>
    %cst_117 = arith.constant 8.000000e+00 : f32
    %222 = vector.broadcast %cst_117 : f32 to vector<64x64xf32>
    %223 = arith.divf %221, %222 : vector<64x64xf32>
    %224 = arith.mulf %223, %223 : vector<64x64xf32>
    %225 = vector.shape_cast %224 : vector<64x64xf32> to vector<1x64x64xf32>
    %cst_118 = arith.constant dense<0.000000e+00> : vector<1xf32>
    %226 = vector.multi_reduction <add>, %225, %cst_118 [1, 2] : vector<1x64x64xf32> to vector<1xf32>
    %227 = vector.shape_cast %226 : vector<1xf32> to vector<1x1x1xf32>
    %228 = vector.extract %227[0, 0, 0] : f32 from vector<1x1x1xf32>
    %cst_119 = arith.constant 4.096000e+03 : f32
    %229 = arith.divf %228, %cst_119 : f32
    %230 = arith.addf %202, %229 : f32
    %cst_120 = arith.constant 5.000000e-01 : f32
    %231 = arith.mulf %cst_120, %230 : f32
    %232 = vector.extract_strided_slice %74 {offsets = [8, 0], sizes = [8, 64], strides = [1, 1]} : vector<16x64xf32> to vector<8x64xf32>
    %233 = vector.extract_strided_slice %28 {offsets = [8, 0], sizes = [8, 64], strides = [1, 1]} : vector<16x64xf32> to vector<8x64xf32>
    %234 = arith.mulf %232, %232 : vector<8x64xf32>
    %cst_121 = arith.constant dense<0.000000e+00> : vector<8xf32>
    %235 = vector.multi_reduction <add>, %234, %cst_121 [1] : vector<8x64xf32> to vector<8xf32>
    %236 = vector.shape_cast %235 : vector<8xf32> to vector<8x1xf32>
    %cst_122 = arith.constant 9.99999996E-13 : f32
    %237 = vector.broadcast %cst_122 : f32 to vector<8x1xf32>
    %238 = arith.addf %236, %237 : vector<8x1xf32>
    %239 = math.rsqrt %238 : vector<8x1xf32>
    %240 = vector.broadcast %239 : vector<8x1xf32> to vector<8x64xf32>
    %241 = arith.mulf %232, %240 : vector<8x64xf32>
    %242 = arith.mulf %233, %233 : vector<8x64xf32>
    %cst_123 = arith.constant dense<0.000000e+00> : vector<8xf32>
    %243 = vector.multi_reduction <add>, %242, %cst_123 [1] : vector<8x64xf32> to vector<8xf32>
    %244 = vector.shape_cast %243 : vector<8xf32> to vector<8x1xf32>
    %cst_124 = arith.constant 9.99999996E-13 : f32
    %245 = vector.broadcast %cst_124 : f32 to vector<8x1xf32>
    %246 = arith.addf %244, %245 : vector<8x1xf32>
    %247 = math.rsqrt %246 : vector<8x1xf32>
    %248 = vector.broadcast %247 : vector<8x1xf32> to vector<8x64xf32>
    %249 = arith.mulf %233, %248 : vector<8x64xf32>
    %cst_125 = arith.constant dense<0.000000e+00> : vector<64x64xf32>
    %250 = tpu.matmul %241, %249, %cst_125 {dimension_numbers = #tpu.dot_dimension_numbers<[0], [0], [1], [1], [0, 1, 1, 1], [], []>} : vector<8x64xf32>, vector<8x64xf32>, vector<64x64xf32> -> vector<64x64xf32>
    %cst_126 = arith.constant 8.000000e+00 : f32
    %251 = vector.broadcast %cst_126 : f32 to vector<64x64xf32>
    %252 = arith.divf %250, %251 : vector<64x64xf32>
    %253 = arith.mulf %252, %252 : vector<64x64xf32>
    %254 = vector.shape_cast %253 : vector<64x64xf32> to vector<1x64x64xf32>
    %cst_127 = arith.constant dense<0.000000e+00> : vector<1xf32>
    %255 = vector.multi_reduction <add>, %254, %cst_127 [1, 2] : vector<1x64x64xf32> to vector<1xf32>
    %256 = vector.shape_cast %255 : vector<1xf32> to vector<1x1x1xf32>
    %257 = vector.extract %256[0, 0, 0] : f32 from vector<1x1x1xf32>
    %cst_128 = arith.constant 4.096000e+03 : f32
    %258 = arith.divf %257, %cst_128 : f32
    %259 = vector.extract_strided_slice %99 {offsets = [8, 0], sizes = [8, 64], strides = [1, 1]} : vector<16x64xf32> to vector<8x64xf32>
    %260 = vector.extract_strided_slice %49 {offsets = [8, 0], sizes = [8, 64], strides = [1, 1]} : vector<16x64xf32> to vector<8x64xf32>
    %261 = arith.mulf %259, %259 : vector<8x64xf32>
    %cst_129 = arith.constant dense<0.000000e+00> : vector<8xf32>
    %262 = vector.multi_reduction <add>, %261, %cst_129 [1] : vector<8x64xf32> to vector<8xf32>
    %263 = vector.shape_cast %262 : vector<8xf32> to vector<8x1xf32>
    %cst_130 = arith.constant 9.99999996E-13 : f32
    %264 = vector.broadcast %cst_130 : f32 to vector<8x1xf32>
    %265 = arith.addf %263, %264 : vector<8x1xf32>
    %266 = math.rsqrt %265 : vector<8x1xf32>
    %267 = vector.broadcast %266 : vector<8x1xf32> to vector<8x64xf32>
    %268 = arith.mulf %259, %267 : vector<8x64xf32>
    %269 = arith.mulf %260, %260 : vector<8x64xf32>
    %cst_131 = arith.constant dense<0.000000e+00> : vector<8xf32>
    %270 = vector.multi_reduction <add>, %269, %cst_131 [1] : vector<8x64xf32> to vector<8xf32>
    %271 = vector.shape_cast %270 : vector<8xf32> to vector<8x1xf32>
    %cst_132 = arith.constant 9.99999996E-13 : f32
    %272 = vector.broadcast %cst_132 : f32 to vector<8x1xf32>
    %273 = arith.addf %271, %272 : vector<8x1xf32>
    %274 = math.rsqrt %273 : vector<8x1xf32>
    %275 = vector.broadcast %274 : vector<8x1xf32> to vector<8x64xf32>
    %276 = arith.mulf %260, %275 : vector<8x64xf32>
    %cst_133 = arith.constant dense<0.000000e+00> : vector<64x64xf32>
    %277 = tpu.matmul %268, %276, %cst_133 {dimension_numbers = #tpu.dot_dimension_numbers<[0], [0], [1], [1], [0, 1, 1, 1], [], []>} : vector<8x64xf32>, vector<8x64xf32>, vector<64x64xf32> -> vector<64x64xf32>
    %cst_134 = arith.constant 8.000000e+00 : f32
    %278 = vector.broadcast %cst_134 : f32 to vector<64x64xf32>
    %279 = arith.divf %277, %278 : vector<64x64xf32>
    %280 = arith.mulf %279, %279 : vector<64x64xf32>
    %281 = vector.shape_cast %280 : vector<64x64xf32> to vector<1x64x64xf32>
    %cst_135 = arith.constant dense<0.000000e+00> : vector<1xf32>
    %282 = vector.multi_reduction <add>, %281, %cst_135 [1, 2] : vector<1x64x64xf32> to vector<1xf32>
    %283 = vector.shape_cast %282 : vector<1xf32> to vector<1x1x1xf32>
    %284 = vector.extract %283[0, 0, 0] : f32 from vector<1x1x1xf32>
    %cst_136 = arith.constant 4.096000e+03 : f32
    %285 = arith.divf %284, %cst_136 : f32
    %286 = arith.addf %258, %285 : f32
    %cst_137 = arith.constant 5.000000e-01 : f32
    %287 = arith.mulf %cst_137, %286 : f32
    %288 = arith.addf %231, %287 : f32
    %c0_138 = arith.constant 0 : index
    %289 = memref.load %arg30[%c0_138] : memref<2xf32, #tpu.memory_space<smem>>
    memref.store %175, %arg30[%c0_138] : memref<2xf32, #tpu.memory_space<smem>>
    %c1 = arith.constant 1 : index
    %290 = memref.load %arg30[%c1] : memref<2xf32, #tpu.memory_space<smem>>
    memref.store %288, %arg30[%c1] : memref<2xf32, #tpu.memory_space<smem>>
    return
  }
}

</mosaic_0001>

<bundles_post_ra>
// kernel: _forward_jit.1
= control target key start
LH: loop header
LB: loop body
LE: loop exit
PB: predicated region body
PF: predicated region fallthrough
CT: control target
= control target key end

     0   :  { %s3262_s6 = smov 1   ;;  %s3263_s10 = smov 2   ;;  %s3924_s0 = inlined_call_operand.smem [shape: u32[31], index: -1, kind: input, shape index: {}] }
   0x1   :  { %s3323_s5 = sld [smem:[%s3924_s0]]   ;;  %s3264_s14 = smov 3  }
   0x2   :  { %s3328_s9 = sld [smem:[%s3924_s0 + %s3262_s6]]   ;;  %s3265_s18 = smov 4  }
   0x3   :  { %s3333_s13 = sld [smem:[%s3924_s0 + %s3263_s10]]   ;;  %s3266_s22 = smov 5  }
   0x4   :  { %s3338_s17 = sld [smem:[%s3924_s0 + %s3264_s14]]   ;;  %s3267_s26 = smov 6  }
   0x5   :  { %s3343_s21 = sld [smem:[%s3924_s0 + %s3265_s18]]   ;;  %s3268_s30 = smov 7  }
   0x6   :  { %s3348_s25 = sld [smem:[%s3924_s0 + %s3266_s22]]   ;;  %s3269_s4 = smov 8  }
   0x7   :  { %s3353_s29 = sld [smem:[%s3924_s0 + %s3267_s26]]   ;;  %s3270_s10 = smov 9  }
   0x8   :  { %s3358_s3 = sld [smem:[%s3924_s0 + %s3268_s30]]   ;;  %s3271_s15 = smov 10  }
   0x9   :  { %s3363_s8 = sld [smem:[%s3924_s0 + %s3269_s4]]   ;;  %s3272_s20 = smov 11  }
   0xa   :  { %s3368_s14 = sld [smem:[%s3924_s0 + %s3270_s10]]   ;;  %s3273_s26 = smov 12  }
   0xb   :  { %3933 = sst [smem:[#allocation39_spill]] %s3343_s21  ;;  %s3274_s1 = smov 13  }
   0xc   :  { %3934 = sst [smem:[#allocation40_spill]] %s3348_s25  ;;  %s3275_s7 = smov 14  }
   0xd   :  { %3935 = sst [smem:[#allocation41_spill]] %s3353_s29  ;;  %s3277_s22 = smov 16  }
   0xe   :  { %s3373_s19 = sld [smem:[%s3924_s0 + %s3271_s15]]   ;;  %s3276_s15 = smov 15  }
   0xf   :  { %3936 = sst [smem:[#allocation42_spill]] %s3363_s8  ;;  %s3278_s28 = smov 17  }
  0x10   :  { %s3378_s24 = sld [smem:[%s3924_s0 + %s3272_s20]]  }
  0x11   :  { %s3383_s30 = sld [smem:[%s3924_s0 + %s3273_s26]]  }
  0x12   :  { %s3388_s6 = sld [smem:[%s3924_s0 + %s3274_s1]]  }
  0x13   :  { %s3393_s12 = sld [smem:[%s3924_s0 + %s3275_s7]]   ;;  %s3279_s7 = smov 18  }
  0x14   :  { %s3398_s20 = sld [smem:[%s3924_s0 + %s3276_s15]]   ;;  %s3280_s15 = smov 19  }
  0x15   :  { %s3403_s27 = sld [smem:[%s3924_s0 + %s3277_s22]]   ;;  %s3281_s22 = smov 20  }
  0x16   :  { %s3408_s4 = sld [smem:[%s3924_s0 + %s3278_s28]]   ;;  %s3282_s28 = smov 21  }
  0x17   :  { %3937 = sst [smem:[#allocation43_spill]] %s3383_s30 }
  0x18   :  { %s3413_s25 = sld [smem:[%s3924_s0 + %s3279_s7]]   ;;  %s3283_s7 = smov 22  }
  0x19   :  { %3938 = sst [smem:[#allocation44_spill]] %s3393_s12 }
  0x1a   :  { %3939 = sst [smem:[#allocation45_spill]] %s3398_s20 }
  0x1b   :  { %3940 = sst [smem:[#allocation46_spill]] %s3403_s27 }
  0x1c   :  { %3941 = sst [smem:[#allocation47_spill]] %s3408_s4 }
  0x1d   :  { %s3418_s20 = sld [smem:[%s3924_s0 + %s3280_s15]]   ;;  %s3284_s15 = smov 23  }
  0x1e   :  { %3942 = sst [smem:[#allocation48_spill]] %s3413_s25 }
  0x1f   :  { %s3423_s27 = sld [smem:[%s3924_s0 + %s3281_s22]]   ;;  %s3285_s22 = smov 24  }
  0x20   :  { %s3428_s4 = sld [smem:[%s3924_s0 + %s3282_s28]]   ;;  %s3286_s28 = smov 25  }
  0x21   :  { %s3433_s25 = sld [smem:[%s3924_s0 + %s3283_s7]]   ;;  %s3287_s7 = smov 26  }
  0x22   :  { %s3443_s12 = sld [smem:[%s3924_s0 + %s3285_s22]]   ;;  %s3289_s22 = smov 28  }
  0x23   :  { %3943 = sst [smem:[#allocation49_spill]] %s3418_s20 }
  0x24   :  { %s3438_s20 = sld [smem:[%s3924_s0 + %s3284_s15]]   ;;  %s3288_s15 = smov 27  }
  0x25   :  { %s3453_s8 = sld [smem:[%s3924_s0 + %s3287_s7]]   ;;  %s3291_s7 = smov 30  }
  0x26   :  { %3944 = sst [smem:[#allocation50_spill]] %s3428_s4 }
  0x27   :  { %s3448_s4 = sld [smem:[%s3924_s0 + %s3286_s28]]   ;;  %s3290_s28 = smov 29  }
  0x28   :  { %s3458_s30 = sld [smem:[%s3924_s0 + %s3288_s15]]  }
  0x29   :  { %s3463_s29 = sld [smem:[%s3924_s0 + %s3289_s22]]  }
  0x2a   :  { %s3468_s21 = sld [smem:[%s3924_s0 + %s3290_s28]]  }
  0x2b   :  { %3945 = sst [smem:[#allocation51_spill]] %s3453_s8 }
  0x2c   :  { %s3473_s8 = sld [smem:[%s3924_s0 + %s3291_s7]]  }
  0x2d   :  { %66 = vsyncpa [#allocation3], 0 }
  0x2e   :  { %67 = vsyncpa [#allocation6], 0 }
  0x2f   :  { %68 = vsyncpa [#allocation9], 0 }
  0x30   :  { %69 = vsyncpa [#allocation12], 0 }
  0x31   :  { %70 = vsyncpa [#allocation15], 0 }
  0x32   :  { %71 = vsyncpa [#allocation18], 0 }
  0x33   :  { %72 = vsyncpa [#allocation21], 0 }
  0x34   :  { %73 = vsyncpa [#allocation24], 0 }
  0x35   :  { %74 = vsyncpa [#allocation27], 0  ;;  %s92_s15 = sshll.u32 %s3328_s9, 4  ;;  %s93_s15 = int_to_ptr.hbm [resolvable:$true] %s92_s15 }
  0x36   :  { %75 = vsyncpa [#allocation4], 0  ;;  %s3292_s16 = smov [#allocation5]   ;;  %s114_s0 = sshll.u32 %s3338_s17, 4  ;;  %s115_s0 = int_to_ptr.hbm [resolvable:$true] %s114_s0 }
  0x37   :  { %s94_s18 = sshll.u32 %s3292_s16, 4  ;;  %s2846_s22 = sshra.s32 %s93_s15, 4  ;;  %s95_s18 = int_to_ptr.vmem [resolvable:$true] %s94_s18  ;;  %s2847_s22 = int_to_ptr.hbm [resolvable:$true] %s2846_s22 }
  0x38   :  { %s2848_s23 = scalar_lea.hbm %s2847_s22, 8  ;;  %s2850_s26 = scalar_lea.hbm %s3328_s9, 8 }
  0x39   :  { %p2849_p0 = scmp.ne.s32.totalorder %s2847_s22, %s2848_s23  ;;  %p2851_p1 = scmp.lt.s32.totalorder %s2847_s22, %s3328_s9 }
  0x3a   :  { %p2852_p2 = scmp.lt.s32.totalorder %s2850_s26, %s2848_s23 }
  0x3c   :  { %p2853_p3 = por %p2852_p2, %p2851_p1 }
  0x3e   :  { %p2854_p4 = pnand %p2853_p3, %p2849_p0 }
  0x40   :  { %2857 = shalt.err (!%p2854_p4)
}
  0x41   :  { %97 = dma.hbm_to_vmem [thread:$0]  %s93_s15, 128, %s95_s18, [#allocation6]  }
  0x42   :  { %s3293_s28 = smov [#allocation8]   ;;  %s144_s2 = sshll.u32 %s3368_s14, 4  ;;  %s145_s2 = int_to_ptr.hbm [resolvable:$true] %s144_s2 }
  0x43   :  { %s116_s1 = sshll.u32 %s3293_s28, 4  ;;  %s2870_s7 = sshra.s32 %s115_s0, 4  ;;  %s117_s1 = int_to_ptr.vmem [resolvable:$true] %s116_s1  ;;  %s2871_s7 = int_to_ptr.hbm [resolvable:$true] %s2870_s7 }
  0x44   :  { %s2872_s10 = scalar_lea.hbm %s2871_s7, 8  ;;  %s2874_s11 = scalar_lea.hbm %s3338_s17, 8 }
  0x45   :  { %p2873_p5 = scmp.ne.s32.totalorder %s2871_s7, %s2872_s10  ;;  %p2875_p6 = scmp.lt.s32.totalorder %s2871_s7, %s3338_s17 }
  0x46   :  { %p2876_p7 = scmp.lt.s32.totalorder %s2874_s11, %s2872_s10 }
  0x48   :  { %p2877_p8 = por %p2876_p7, %p2875_p6 }
  0x4a   :  { %p2878_p9 = pnand %p2877_p8, %p2873_p5 }
  0x4c   :  { %2881 = shalt.err (!%p2878_p9)
}
  0x4d   :  { %119 = dma.hbm_to_vmem [thread:$0]  %s115_s0, 128, %s117_s1, [#allocation9]  }
  0x4e   :  { %s168_s9 = sshll.u32 %s3378_s24, 4  ;;  %s3294_s15 = smov [#allocation11]   ;;  %s169_s9 = int_to_ptr.hbm [resolvable:$true] %s168_s9 }
  0x4f   :  { %s146_s16 = sshll.u32 %s3294_s15, 4  ;;  %s2894_s18 = sshra.s32 %s145_s2, 4  ;;  %s147_s16 = int_to_ptr.vmem [resolvable:$true] %s146_s16  ;;  %s2895_s18 = int_to_ptr.hbm [resolvable:$true] %s2894_s18 }
  0x50   :  { %s2896_s22 = scalar_lea.hbm %s2895_s18, 1  ;;  %s2898_s23 = scalar_lea.hbm %s3368_s14, 1 }
  0x51   :  { %p2897_p10 = scmp.ne.s32.totalorder %s2895_s18, %s2896_s22  ;;  %p2899_p11 = scmp.lt.s32.totalorder %s2895_s18, %s3368_s14 }
  0x52   :  { %p2900_p12 = scmp.lt.s32.totalorder %s2898_s23, %s2896_s22 }
  0x54   :  { %p2901_p13 = por %p2900_p12, %p2899_p11 }
  0x56   :  { %p2902_p0 = pnand %p2901_p13, %p2897_p10 }
  0x58   :  { %2905 = shalt.err (!%p2902_p0)
}
  0x59   :  { %149 = dma.hbm_to_vmem [thread:$0]  %s145_s2, 16, %s147_s16, [#allocation12]  }
  0x5a   :  { %s3295_s17 = smov [#allocation14]   ;;  %s204_s26 = sshll.u32 %s3423_s27, 4  ;;  %s205_s26 = int_to_ptr.hbm [resolvable:$true] %s204_s26 }
  0x5b   :  { %s170_s0 = sshll.u32 %s3295_s17, 4  ;;  %s2918_s28 = sshra.s32 %s169_s9, 4  ;;  %s171_s0 = int_to_ptr.vmem [resolvable:$true] %s170_s0  ;;  %s2919_s28 = int_to_ptr.hbm [resolvable:$true] %s2918_s28 }
  0x5c   :  { %s2920_s1 = scalar_lea.hbm %s2919_s28, 1  ;;  %s2922_s7 = scalar_lea.hbm %s3378_s24, 1 }
  0x5d   :  { %p2921_p1 = scmp.ne.s32.totalorder %s2919_s28, %s2920_s1  ;;  %p2923_p2 = scmp.lt.s32.totalorder %s2919_s28, %s3378_s24 }
  0x5e   :  { %p2924_p3 = scmp.lt.s32.totalorder %s2922_s7, %s2920_s1 }
  0x60   :  { %p2925_p4 = por %p2924_p3, %p2923_p2 }
  0x62   :  { %p2926_p5 = pnand %p2925_p4, %p2921_p1 }
  0x64   :  { %2929 = shalt.err (!%p2926_p5)
}
  0x65   :  { %173 = dma.hbm_to_vmem [thread:$0]  %s169_s9, 16, %s171_s0, [#allocation15]  }
  0x66   :  { %s3296_s14 = smov [#allocation17]   ;;  %s227_s10 = sshll.u32 %s3438_s20, 4  ;;  %s228_s10 = int_to_ptr.hbm [resolvable:$true] %s227_s10 }
  0x67   :  { %s206_s2 = sshll.u32 %s3296_s14, 4  ;;  %s2942_s11 = sshra.s32 %s205_s26, 4  ;;  %s207_s2 = int_to_ptr.vmem [resolvable:$true] %s206_s2  ;;  %s2943_s11 = int_to_ptr.hbm [resolvable:$true] %s2942_s11 }
  0x68   :  { %s2944_s15 = scalar_lea.hbm %s2943_s11, 1  ;;  %s2946_s16 = scalar_lea.hbm %s3423_s27, 1 }
  0x69   :  { %p2945_p6 = scmp.ne.s32.totalorder %s2943_s11, %s2944_s15  ;;  %p2947_p7 = scmp.lt.s32.totalorder %s2943_s11, %s3423_s27 }
  0x6a   :  { %p2948_p8 = scmp.lt.s32.totalorder %s2946_s16, %s2944_s15 }
  0x6c   :  { %p2949_p9 = por %p2948_p8, %p2947_p7 }
  0x6e   :  { %p2950_p10 = pnand %p2949_p9, %p2945_p6 }
  0x70   :  { %2953 = shalt.err (!%p2950_p10)
}
  0x71   :  { %209 = dma.hbm_to_vmem [thread:$0]  %s205_s26, 16, %s207_s2, [#allocation18]  }
  0x72   :  { %s3297_s24 = smov [#allocation20]   ;;  %s254_s18 = sshll.u32 %s3448_s4, 4  ;;  %s3492_s18 = int_to_ptr.hbm [resolvable:$true] %s254_s18 }
  0x73   :  { %s229_s9 = sshll.u32 %s3297_s24, 4  ;;  %s2966_s22 = sshra.s32 %s228_s10, 4  ;;  %s230_s9 = int_to_ptr.vmem [resolvable:$true] %s229_s9  ;;  %s2967_s22 = int_to_ptr.hbm [resolvable:$true] %s2966_s22 }
  0x74   :  { %s2968_s23 = scalar_lea.hbm %s2967_s22, 8  ;;  %s2970_s27 = scalar_lea.hbm %s3438_s20, 8 }
  0x75   :  { %p2969_p11 = scmp.ne.s32.totalorder %s2967_s22, %s2968_s23  ;;  %p2971_p12 = scmp.lt.s32.totalorder %s2967_s22, %s3438_s20 }
  0x76   :  { %p2972_p13 = scmp.lt.s32.totalorder %s2970_s27, %s2968_s23 }
  0x78   :  { %p2973_p0 = por %p2972_p13, %p2971_p12 }
  0x7a   :  { %p2974_p1 = pnand %p2973_p0, %p2969_p11 }
  0x7c   :  { %2977 = shalt.err (!%p2974_p1)
}
  0x7d   :  { %s3298_s17 = smov 64   ;;  %s3299_s0 = smov 4  }
  0x7e   :  { %235 = dma.hbm_to_vmem [thread:$0]  %s228_s10, 128, %s230_s9, [#allocation21], %s3298_s17, %s3298_s17, %s3299_s0  }
  0x7f   :  { %s81_s26 = sshll.u32 %s3323_s5, 4  ;;  %s3300_s28 = smov [#allocation23]   ;;  %s82_s26 = int_to_ptr.hbm [resolvable:$true] %s81_s26 }
  0x80   :  { %s256_s1 = sshll.u32 %s3300_s28, 4  ;;  %s2990_s20 = sshra.s32 %s3492_s18, 4  ;;  %s257_s1 = int_to_ptr.vmem [resolvable:$true] %s256_s1  ;;  %s2991_s20 = int_to_ptr.hbm [resolvable:$true] %s2990_s20 }
  0x81   :  { %s2992_s7 = scalar_lea.hbm %s2991_s20, 1  ;;  %s2994_s14 = scalar_lea.hbm %s3448_s4, 1 }
  0x82   :  { %p2993_p2 = scmp.ne.s32.totalorder %s2991_s20, %s2992_s7  ;;  %p2995_p3 = scmp.lt.s32.totalorder %s2991_s20, %s3448_s4 }
  0x83   :  { %p2996_p4 = scmp.lt.s32.totalorder %s2994_s14, %s2992_s7 }
  0x85   :  { %p2997_p5 = por %p2996_p4, %p2995_p3 }
  0x87   :  { %p2998_p6 = pnand %p2997_p5, %p2993_p2 }
  0x89   :  { %3001 = shalt.err (!%p2998_p6)
}
  0x8a   :  { %259 = dma.hbm_to_vmem [thread:$0]  %s3492_s18, 16, %s257_s1, [#allocation24]  }
  0x8b   :  { %s3301_s2 = smov [#allocation2]   ;;  %s103_s11 = sshll.u32 %s3333_s13, 4  ;;  %s104_s11 = int_to_ptr.hbm [resolvable:$true] %s103_s11 }
  0x8c   :  { %s83_s10 = sshll.u32 %s3301_s2, 4  ;;  %s3014_s15 = sshra.s32 %s82_s26, 4  ;;  %s84_s10 = int_to_ptr.vmem [resolvable:$true] %s83_s10  ;;  %s3015_s15 = int_to_ptr.hbm [resolvable:$true] %s3014_s15 }
  0x8d   :  { %s3016_s16 = scalar_lea.hbm %s3015_s15, 8  ;;  %s3018_s24 = scalar_lea.hbm %s3323_s5, 8 }
  0x8e   :  { %p3017_p7 = scmp.ne.s32.totalorder %s3015_s15, %s3016_s16  ;;  %p3019_p8 = scmp.lt.s32.totalorder %s3015_s15, %s3323_s5 }
  0x8f   :  { %p3020_p9 = scmp.lt.s32.totalorder %s3018_s24, %s3016_s16 }
  0x91   :  { %p3021_p10 = por %p3020_p9, %p3019_p8 }
  0x93   :  { %p3022_p11 = pnand %p3021_p10, %p3017_p7 }
  0x95   :  { %3025 = shalt.err (!%p3022_p11)
}
  0x96   :  { %86 = dma.hbm_to_vmem [thread:$0]  %s82_s26, 128, %s84_s10, [#allocation3]  }
  0x97   :  { %s131_s4 = sshll.u32 %s3358_s3, 4  ;;  %s3302_s9 = smov [#allocation7]   ;;  %s132_s4 = int_to_ptr.hbm [resolvable:$true] %s131_s4 }
  0x98   :  { %s105_s18 = sshll.u32 %s3302_s9, 4  ;;  %s3038_s22 = sshra.s32 %s104_s11, 4  ;;  %s106_s18 = int_to_ptr.vmem [resolvable:$true] %s105_s18  ;;  %s3039_s22 = int_to_ptr.hbm [resolvable:$true] %s3038_s22 }
  0x99   :  { %s3040_s23 = scalar_lea.hbm %s3039_s22, 8  ;;  %s3042_s27 = scalar_lea.hbm %s3333_s13, 8 }
  0x9a   :  { %p3041_p12 = scmp.ne.s32.totalorder %s3039_s22, %s3040_s23  ;;  %p3043_p13 = scmp.lt.s32.totalorder %s3039_s22, %s3333_s13 }
  0x9b   :  { %p3044_p0 = scmp.lt.s32.totalorder %s3042_s27, %s3040_s23 }
  0x9d   :  { %p3045_p1 = por %p3044_p0, %p3043_p13 }
  0x9f   :  { %p3046_p2 = pnand %p3045_p1, %p3041_p12 }
  0xa1   :  { %3049 = shalt.err (!%p3046_p2)
}
  0xa2   :  { %108 = dma.hbm_to_vmem [thread:$0]  %s104_s11, 128, %s106_s18, [#allocation6]  }
  0xa3   :  { %s3303_s5 = smov [#allocation10]   ;;  %s154_s28 = sshll.u32 %s3373_s19, 4  ;;  %s3511_s28 = int_to_ptr.hbm [resolvable:$true] %s154_s28 }
  0xa4   :  { %s133_s26 = sshll.u32 %s3303_s5, 4  ;;  %s3062_s1 = sshra.s32 %s132_s4, 4  ;;  %s134_s26 = int_to_ptr.vmem [resolvable:$true] %s133_s26  ;;  %s3063_s1 = int_to_ptr.hbm [resolvable:$true] %s3062_s1 }
  0xa5   :  { %s3064_s20 = scalar_lea.hbm %s3063_s1, 1  ;;  %s3066_s7 = scalar_lea.hbm %s3358_s3, 1 }
  0xa6   :  { %p3065_p3 = scmp.ne.s32.totalorder %s3063_s1, %s3064_s20  ;;  %p3067_p4 = scmp.lt.s32.totalorder %s3063_s1, %s3358_s3 }
  0xa7   :  { %p3068_p5 = scmp.lt.s32.totalorder %s3066_s7, %s3064_s20 }
  0xa9   :  { %p3069_p6 = por %p3068_p5, %p3067_p4 }
  0xab   :  { %p3070_p7 = pnand %p3069_p6, %p3065_p3 }
  0xad   :  { %3073 = shalt.err (!%p3070_p7)
}
  0xae   :  { %136 = dma.hbm_to_vmem [thread:$0]  %s132_s4, 16, %s134_s26, [#allocation9]  }
  0xaf   :  { %s181_s13 = sshll.u32 %s3388_s6, 4  ;;  %s3304_s14 = smov [#allocation13]   ;;  %s182_s13 = int_to_ptr.hbm [resolvable:$true] %s181_s13 }
  0xb0   :  { %s156_s2 = sshll.u32 %s3304_s14, 4  ;;  %s3086_s10 = sshra.s32 %s3511_s28, 4  ;;  %s157_s2 = int_to_ptr.vmem [resolvable:$true] %s156_s2  ;;  %s3087_s10 = int_to_ptr.hbm [resolvable:$true] %s3086_s10 }
  0xb1   :  { %s3088_s11 = scalar_lea.hbm %s3087_s10, 8  ;;  %s3090_s15 = scalar_lea.hbm %s3373_s19, 8 }
  0xb2   :  { %p3089_p8 = scmp.ne.s32.totalorder %s3087_s10, %s3088_s11  ;;  %p3091_p9 = scmp.lt.s32.totalorder %s3087_s10, %s3373_s19 }
  0xb3   :  { %p3092_p10 = scmp.lt.s32.totalorder %s3090_s15, %s3088_s11 }
  0xb5   :  { %p3093_p11 = por %p3092_p10, %p3091_p9 }
  0xb7   :  { %p3094_p12 = pnand %p3093_p11, %p3089_p8 }
  0xb9   :  { %3097 = shalt.err (!%p3094_p12)
}
  0xba   :  { %162 = dma.hbm_to_vmem [thread:$0]  %s3511_s28, 128, %s157_s2, [#allocation12], %s3298_s17, %s3298_s17, %s3299_s0  }
  0xbb   :  { %s3305_s3 = smov [#allocation16]   ;;  %s217_s24 = sshll.u32 %s3433_s25, 4  ;;  %s218_s24 = int_to_ptr.hbm [resolvable:$true] %s217_s24 }
  0xbc   :  { %s183_s16 = sshll.u32 %s3305_s3, 4  ;;  %s3110_s4 = sshra.s32 %s182_s13, 4  ;;  %s184_s16 = int_to_ptr.vmem [resolvable:$true] %s183_s16  ;;  %s3111_s4 = int_to_ptr.hbm [resolvable:$true] %s3110_s4 }
  0xbd   :  { %s3112_s19 = scalar_lea.hbm %s3111_s4, 1  ;;  %s3114_s9 = scalar_lea.hbm %s3388_s6, 1 }
  0xbe   :  { %p3113_p13 = scmp.ne.s32.totalorder %s3111_s4, %s3112_s19  ;;  %p3115_p0 = scmp.lt.s32.totalorder %s3111_s4, %s3388_s6 }
  0xbf   :  { %p3116_p1 = scmp.lt.s32.totalorder %s3114_s9, %s3112_s19 }
  0xc1   :  { %p3117_p2 = por %p3116_p1, %p3115_p0 }
  0xc3   :  { %p3118_p3 = pnand %p3117_p2, %p3113_p13 }
  0xc5   :  { %3121 = shalt.err (!%p3118_p3)
}
  0xc6   :  { %186 = dma.hbm_to_vmem [thread:$0]  %s182_s13, 16, %s184_s16, [#allocation15]  }
  0xc7   :  { %s240_s18 = sshll.u32 %s3443_s12, 4  ;;  %s3306_s22 = smov [#allocation19]   ;;  %s3527_s18 = int_to_ptr.hbm [resolvable:$true] %s240_s18 }
  0xc8   :  { %s219_s23 = sshll.u32 %s3306_s22, 4  ;;  %s3134_s27 = sshra.s32 %s218_s24, 4  ;;  %s220_s23 = int_to_ptr.vmem [resolvable:$true] %s219_s23  ;;  %s3135_s27 = int_to_ptr.hbm [resolvable:$true] %s3134_s27 }
  0xc9   :  { %s3136_s5 = scalar_lea.hbm %s3135_s27, 1  ;;  %s3138_s26 = scalar_lea.hbm %s3433_s25, 1 }
  0xca   :  { %p3137_p4 = scmp.ne.s32.totalorder %s3135_s27, %s3136_s5  ;;  %p3139_p5 = scmp.lt.s32.totalorder %s3135_s27, %s3433_s25 }
  0xcb   :  { %p3140_p6 = scmp.lt.s32.totalorder %s3138_s26, %s3136_s5 }
  0xcd   :  { %p3141_p7 = por %p3140_p6, %p3139_p5 }
  0xcf   :  { %p3142_p8 = pnand %p3141_p7, %p3137_p4 }
  0xd1   :  { %3145 = shalt.err (!%p3142_p8)
}
  0xd2   :  { %222 = dma.hbm_to_vmem [thread:$0]  %s218_s24, 16, %s220_s23, [#allocation18]  }
  0xd3   :  { %s3307_s6 = smov [#allocation22]   ;;  %s267_s1 = sshll.u32 %s3458_s30, 4  ;;  %s268_s1 = int_to_ptr.hbm [resolvable:$true] %s267_s1 }
  0xd4   :  { %s242_s28 = sshll.u32 %s3307_s6, 4  ;;  %s3158_s20 = sshra.s32 %s3527_s18, 4  ;;  %s243_s28 = int_to_ptr.vmem [resolvable:$true] %s242_s28  ;;  %s3159_s20 = int_to_ptr.hbm [resolvable:$true] %s3158_s20 }
  0xd5   :  { %s3160_s7 = scalar_lea.hbm %s3159_s20, 32  ;;  %s3162_s13 = scalar_lea.hbm %s3443_s12, 32 }
  0xd6   :  { %p3161_p9 = scmp.ne.s32.totalorder %s3159_s20, %s3160_s7  ;;  %p3163_p10 = scmp.lt.s32.totalorder %s3159_s20, %s3443_s12 }
  0xd7   :  { %p3164_p11 = scmp.lt.s32.totalorder %s3162_s13, %s3160_s7 }
  0xd9   :  { %p3165_p12 = por %p3164_p11, %p3163_p10 }
  0xdb   :  { %p3166_p13 = pnand %p3165_p12, %p3161_p9 }
  0xdd   :  { %3169 = shalt.err (!%p3166_p13)
}
  0xde   :  { %248 = dma.hbm_to_vmem [thread:$0]  %s3527_s18, 512, %s243_s28, [#allocation21], %s3298_s17, %s3298_s17, %s3299_s0  }
  0xdf   :  { %s280_s25 = sshll.u32 %s3468_s21, 4  ;;  %s3308_s14 = smov [#allocation25]   ;;  %s281_s25 = int_to_ptr.hbm [resolvable:$true] %s280_s25 }
  0xe0   :  { %s269_s2 = sshll.u32 %s3308_s14, 4  ;;  %s3182_s10 = sshra.s32 %s268_s1, 4  ;;  %s270_s2 = int_to_ptr.vmem [resolvable:$true] %s269_s2  ;;  %s3183_s10 = int_to_ptr.hbm [resolvable:$true] %s3182_s10 }
  0xe1   :  { %s3184_s12 = scalar_lea.hbm %s3183_s10, 1  ;;  %s3186_s11 = scalar_lea.hbm %s3458_s30, 1 }
  0xe2   :  { %p3185_p0 = scmp.ne.s32.totalorder %s3183_s10, %s3184_s12  ;;  %p3187_p1 = scmp.lt.s32.totalorder %s3183_s10, %s3458_s30 }
  0xe3   :  { %p3188_p2 = scmp.lt.s32.totalorder %s3186_s11, %s3184_s12 }
  0xe5   :  { %p3189_p3 = por %p3188_p2, %p3187_p1 }
  0xe7   :  { %p3190_p4 = pnand %p3189_p3, %p3185_p0 }
  0xe9   :  { %3193 = shalt.err (!%p3190_p4)
}
  0xea   :  { %272 = dma.hbm_to_vmem [thread:$0]  %s268_s1, 16, %s270_s2, [#allocation24]  }
  0xeb   :  { %s3309_s15 = smov [#allocation26]   ;;  %s3206_s3 = sshra.s32 %s281_s25, 4  ;;  %s3207_s3 = int_to_ptr.hbm [resolvable:$true] %s3206_s3 }
  0xec   :  { %s282_s0 = sshll.u32 %s3309_s15, 4  ;;  %s3208_s16 = scalar_lea.hbm %s3207_s3, 1  ;;  %s283_s0 = int_to_ptr.vmem [resolvable:$true] %s282_s0 }
  0xed   :  { %p3209_p5 = scmp.ne.s32.totalorder %s3207_s3, %s3208_s16  ;;  %s3210_s24 = scalar_lea.hbm %s3468_s21, 1 }
  0xee   :  { %p3211_p6 = scmp.lt.s32.totalorder %s3207_s3, %s3468_s21  ;;  %p3212_p7 = scmp.lt.s32.totalorder %s3210_s24, %s3208_s16 }
  0xf0   :  { %p3213_p8 = por %p3212_p7, %p3211_p6 }
  0xf2   :  { %p3214_p9 = pnand %p3213_p8, %p3209_p5 }
  0xf4   :  { %3217 = shalt.err (!%p3214_p9)
}
  0xf5   :  { %285 = dma.hbm_to_vmem [thread:$0]  %s281_s25, 16, %s283_s0, [#allocation27]  }
  0xf6   :  { %3242 = dma.done.wait [#allocation3], 128  }
  0xf7   :  { %3243 = vsyncadd [#allocation3], 4294967168 }
  0xf8   :  { %3244 = dma.done.wait [#allocation6], 256  }
  0xf9   :  { %3245 = vsyncadd [#allocation6], 4294967040 }
  0xfa   :  { %3246 = dma.done.wait [#allocation9], 144  }
  0xfb   :  { %3247 = vsyncadd [#allocation9], 4294967152 }
  0xfc   :  { %3248 = dma.done.wait [#allocation12], 144  }
  0xfd   :  { %3249 = vsyncadd [#allocation12], 4294967152 }
  0xfe   :  { %3250 = dma.done.wait [#allocation15], 32  }
  0xff   :  { %3251 = vsyncadd [#allocation15], 4294967264 }
 0x100   :  { %3252 = dma.done.wait [#allocation18], 32  }
 0x101   :  { %3253 = vsyncadd [#allocation18], 4294967264 }
 0x102   :  { %3254 = dma.done.wait [#allocation21], 640  }
 0x103   :  { %3255 = vsyncadd [#allocation21], 4294966656 }
 0x104   :  { %3256 = dma.done.wait [#allocation24], 32  }
 0x105   :  { %3257 = vsyncadd [#allocation24], 4294967264 }
 0x106   :  { %3258 = dma.done.wait [#allocation27], 16  }
 0x107   :  { %3259 = vsyncadd [#allocation27], 4294967280  ;;  %s3946_s21 = sld [smem:[#allocation39_spill]]  ;;  %v2660_v1 = vld [vmem:[#allocation13] sm:$0xff]  ;;  %v354_v4 = vld [vmem:[#allocation7] sm:$0xff]  ;;  %vm369_vm0 = vcmask 130048  }
 0x108   :  { %s3947_s30 = sld [smem:[#allocation41_spill]]  ;;  %v351_v2 = vld [vmem:[#allocation2] sm:$0xff]  ;;  %v352_v3 = vld [vmem:[#allocation5] sm:$0xff]  ;;  %v355_v5 = vld [vmem:[#allocation8] sm:$0xff]  ;;  %579 = vmatpush.bf16.msra.mxu3 %v2660_v1  ;;  %vm791_vm1 = vcmask 523264  }
 0x109   :  { %s3948_s4 = sld [smem:[#allocation43_spill]]  ;;  %v3545_v6 = vpack.c.bf16 %v352_v3, %v351_v2  ;;  %v3547_v7 = vpack.c.bf16 %v355_v5, %v354_v4  ;;  %v2789_v35 = vld [vmem:[#allocation14] ss:$0 sm:$0xff]  ;;  %v2790_v59 = vld [vmem:[#allocation10] ss:$0 sm:$0xff] }
 0x10a   :  { %s3949_s19 = sld [smem:[#allocation42_spill]]  ;;  %v2791_v63 = vld [vmem:[#allocation16] ss:$0 sm:$0xff] }
 0x10b   :  { %2374 = vmatmul.msk.bf16.vlgmr.msra.gmra.mxu3 %vm369_vm0, %v3547_v7  ;;  %s3950_s9 = sld [smem:[#allocation44_spill]] }
 0x10c   :  { %s3951_s18 = sld [smem:[#allocation40_spill]] }
 0x10d   :  { %v2643_v0 = vld [vmem:[%s3946_s21] sm:$0xff]  ;;  %s3952_s22 = sld [smem:[#allocation46_spill]] }
 0x10e   :  { %380 = vmatpush.bf16.msra.mxu0 %v2643_v0  ;;  %v2651_v8 = vld [vmem:[%s3947_s30 + $0x38] sm:$0xff]  ;;  %v2650_v10 = vld [vmem:[%s3947_s30 + $0x30] sm:$0xff]  ;;  %v2649_v12 = vld [vmem:[%s3947_s30 + $0x28] sm:$0xff]  ;;  %s3953_s23 = sld [smem:[#allocation47_spill]] }
 0x10f   :  { %v2668_v9 = vld [vmem:[%s3948_s4 + $0x38] sm:$0xff]  ;;  %458 = vmatpush.bf16.msra.mxu1 %v2651_v8  ;;  %v2667_v11 = vld [vmem:[%s3948_s4 + $0x30] sm:$0xff]  ;;  %v2666_v13 = vld [vmem:[%s3948_s4 + $0x28] sm:$0xff]  ;;  %s3954_s27 = sld [smem:[#allocation45_spill]] }
 0x110   :  { %v2648_v14 = vld [vmem:[%s3947_s30 + $0x20] sm:$0xff]  ;;  %v2647_v15 = vld [vmem:[%s3947_s30 + $0x18] sm:$0xff]  ;;  %v2646_v17 = vld [vmem:[%s3947_s30 + $0x10] sm:$0xff]  ;;  %s3955_s5 = sld [smem:[#allocation49_spill]] }
 0x111   :  { %2305 = vmatmul.msk.bf16.vlgmr.msra.gmra.mxu0 %vm369_vm0, %v3545_v6  ;;  %v2665_v16 = vld [vmem:[%s3948_s4 + $0x20] sm:$0xff]  ;;  %v2664_v18 = vld [vmem:[%s3948_s4 + $0x18] sm:$0xff]  ;;  %v2645_v19 = vld [vmem:[%s3947_s30 + $0x8] sm:$0xff]  ;;  %s3956_s26 = sld [smem:[#allocation51_spill]] }
 0x112   :  { %657 = vmatpush.bf16.msrb.mxu0 %v2668_v9  ;;  %v2663_v20 = vld [vmem:[%s3948_s4 + $0x10] sm:$0xff]  ;;  %v2644_v21 = vld [vmem:[%s3947_s30] sm:$0xff]  ;;  %v2662_v22 = vld [vmem:[%s3948_s4 + $0x8] sm:$0xff] }
 0x113   :  { %459 = vmatpush.bf16.msra.mxu1 %v2650_v10  ;;  %v2661_v23 = vld [vmem:[%s3948_s4] sm:$0xff]  ;;  %v2659_v24 = vld [vmem:[%s3949_s19 + $0x38] sm:$0xff]  ;;  %v2658_v26 = vld [vmem:[%s3949_s19 + $0x30] sm:$0xff] }
 0x114   :  { %v2676_v25 = vld [vmem:[%s3950_s9 + $0x38] sm:$0xff]  ;;  %543 = vmatpush.bf16.msra.mxu2 %v2659_v24  ;;  %v2675_v27 = vld [vmem:[%s3950_s9 + $0x30] sm:$0xff]  ;;  %v2657_v28 = vld [vmem:[%s3949_s19 + $0x28] sm:$0xff] }
 0x115   :  { %742 = vmatpush.bf16.msrb.mxu3 %v2676_v25  ;;  %v2674_v29 = vld [vmem:[%s3950_s9 + $0x28] sm:$0xff]  ;;  %v2656_v30 = vld [vmem:[%s3949_s19 + $0x20] sm:$0xff]  ;;  %v2655_v47 = vld [vmem:[%s3949_s19 + $0x18] sm:$0xff] }
 0x116   :  { %658 = vmatpush.bf16.msrb.mxu0 %v2667_v11  ;;  %v2788_v32 = vld [vmem:[%s3951_s18] ss:$0 sm:$0xff]  ;;  %v2654_v49 = vld [vmem:[%s3949_s19 + $0x10] sm:$0xff]  ;;  %v2672_v50 = vld [vmem:[%s3950_s9 + $0x18] sm:$0xff] }
 0x117   :  { %460 = vmatpush.bf16.msra.mxu1 %v2649_v12  ;;  %v2673_v48 = vld [vmem:[%s3950_s9 + $0x20] sm:$0xff]  ;;  %v2653_v51 = vld [vmem:[%s3949_s19 + $0x8] sm:$0xff]  ;;  %v2671_v52 = vld [vmem:[%s3950_s9 + $0x10] sm:$0xff] }
 0x118   :  { %544 = vmatpush.bf16.msra.mxu2 %v2658_v26  ;;  %v2652_v53 = vld [vmem:[%s3949_s19] sm:$0xff]  ;;  %v2670_v54 = vld [vmem:[%s3950_s9 + $0x8] sm:$0xff]  ;;  %v2681_v57 = vld [vmem:[%s3953_s23 + $0x18] sm:$0xff]  ;;  %s2252_s19 = sshll.u32 %s3473_s8, 4  ;;  %s2253_s19 = int_to_ptr.vmem [resolvable:$true] %s2252_s19 }
 0x119   :  { %743 = vmatpush.bf16.msrb.mxu3 %v2675_v27  ;;  %v2669_v55 = vld [vmem:[%s3950_s9] sm:$0xff]  ;;  %v2680_v12 = vld [vmem:[%s3953_s23 + $0x10] sm:$0xff] }
 0x11a   :  { %659 = vmatpush.bf16.msrb.mxu0 %v2666_v13  ;;  %v2677_v56 = vld [vmem:[%s3952_s22] sm:$0xff]  ;;  %v2679_v13 = vld [vmem:[%s3953_s23 + $0x8] sm:$0xff]  ;;  %s3230_s22 = sshra.s32 %s2253_s19, 4  ;;  %s3231_s22 = int_to_ptr.vmem [resolvable:$true] %s3230_s22 }
 0x11b   :  { %461 = vmatpush.bf16.msra.mxu1 %v2648_v14  ;;  %v2698_v14 = vld [vmem:[#allocation20] sm:$0xff]  ;;  %p3235_p11 = scmp.lt.s32.totalorder %s3231_s22, %s3473_s8 }
 0x11c   :  { %545 = vmatpush.bf16.msra.mxu2 %v2657_v28 }
 0x11d   :  { %744 = vmatpush.bf16.msrb.mxu3 %v2674_v29 }
 0x11e   :  { %660 = vmatpush.bf16.msrb.mxu0 %v2665_v16  ;;  %v2702_v16 = vld [vmem:[#allocation22 + $0x18] sm:$0xff] }
 0x11f   :  { %462 = vmatpush.bf16.msra.mxu1 %v2647_v15  ;;  %v2678_v15 = vld [vmem:[%s3953_s23] sm:$0xff]  ;;  %s3232_s23 = scalar_lea.vmem %s3231_s22, 1 }
 0x120   :  { %546 = vmatpush.bf16.msra.mxu2 %v2656_v30  ;;  %p3233_p10 = scmp.ne.s32.totalorder %s3231_s22, %s3232_s23 }
 0x121   :  { %745 = vmatpush.bf16.msrb.mxu3 %v2673_v48  ;;  %v2684_v48 = vld [vmem:[%s3955_s5 + $0x10] sm:$0xff] }
 0x122   :  { %661 = vmatpush.bf16.msrb.mxu0 %v2664_v18  ;;  %v2700_v18 = vld [vmem:[#allocation22 + $0x8] sm:$0xff] }
 0x123   :  { %463 = vmatpush.bf16.msra.mxu1 %v2646_v17  ;;  %v2701_v17 = vld [vmem:[#allocation22 + $0x10] sm:$0xff] }
 0x124   :  { %547 = vmatpush.bf16.msra.mxu2 %v2655_v47  ;;  %v2715_v47 = vld [vmem:[%s3463_s29 + $0x20] sm:$0xff] }
 0x125   :  { %746 = vmatpush.bf16.msrb.mxu3 %v2672_v50  ;;  %v2714_v50 = vld [vmem:[%s3463_s29 + $0x18] sm:$0xff] }
 0x126   :  { %662 = vmatpush.bf16.msrb.mxu0 %v2663_v20 }
 0x127   :  { %464 = vmatpush.bf16.msra.mxu1 %v2645_v19  ;;  %v2699_v19 = vld [vmem:[#allocation22] sm:$0xff] }
 0x128   :  { %548 = vmatpush.bf16.msra.mxu2 %v2654_v49  ;;  %v2709_v49 = vld [vmem:[%s3956_s26 + $0x30] sm:$0xff] }
 0x129   :  { %747 = vmatpush.bf16.msrb.mxu3 %v2671_v52  ;;  %v2708_v52 = vld [vmem:[%s3956_s26 + $0x28] sm:$0xff] }
 0x12a   :  { %663 = vmatpush.bf16.msrb.mxu0 %v2662_v22  ;;  %v2793_v22 = vld [vmem:[%s3954_s27] ss:$0 sm:$0xff]  ;;  %s3234_s27 = scalar_lea.vmem %s3473_s8, 1 }
 0x12b   :  { %465 = vmatpush.bf16.msra.mxu1 %v2644_v21  ;;  %p3236_p12 = scmp.lt.s32.totalorder %s3234_s27, %s3232_s23 }
 0x12c   :  { %549 = vmatpush.bf16.msra.mxu2 %v2653_v51  ;;  %v2683_v51 = vld [vmem:[%s3955_s5 + $0x8] sm:$0xff] }
 0x12d   :  { %748 = vmatpush.bf16.msrb.mxu3 %v2670_v54  ;;  %v2682_v54 = vld [vmem:[%s3955_s5] sm:$0xff]  ;;  %p3237_p13 = por %p3236_p12, %p3235_p11 }
 0x12e   :  { %664 = vmatpush.bf16.msrb.mxu0 %v2661_v23 }
 0x12f   :  { %799 = vmatpush.bf16.msrb.mxu1 %v2681_v57  ;;  %v2706_v57 = vld [vmem:[%s3956_s26 + $0x18] sm:$0xff]  ;;  %p3238_p0 = pnand %p3237_p13, %p3233_p10 }
 0x130   :  { %550 = vmatpush.bf16.msra.mxu2 %v2652_v53  ;;  %v2713_v53 = vld [vmem:[%s3463_s29 + $0x10] sm:$0xff] }
 0x131   :  { %749 = vmatpush.bf16.msrb.mxu3 %v2669_v55  ;;  %v2707_v55 = vld [vmem:[%s3956_s26 + $0x20] sm:$0xff] }
 0x133   :  { %800 = vmatpush.bf16.msrb.mxu1 %v2680_v12 }
 0x134   :  { %822 = vmatpush.bf16.msrb.mxu2 %v2677_v56  ;;  %v2712_v56 = vld [vmem:[%s3463_s29 + $0x8] sm:$0xff] }
 0x137   :  { %801 = vmatpush.bf16.msrb.mxu1 %v2679_v13 }
 0x13b   :  { %802 = vmatpush.bf16.msrb.mxu1 %v2678_v15 }
 0x18e   :  { %v382_v31 = vpop.f32.mrf.mxu0  ;;  %v581_v33 = vpop.f32.mrf.mxu3 }
 0x18f   :  { %v383_v34 = vadd.f32 %v2788_v32, %v382_v31  ;;  %v582_v39 = vadd.f32 %v2789_v35, %v581_v33 }
 0x191   :  { %v387_v38 = vmax.f32 %v383_v34, 0.0  ;;  %v586_v43 = vmax.f32 %v582_v39, 0.0  ;;  %v2688_v39 = vld [vmem:[%s3955_s5 + $0x30] sm:$0xff] }
 0x196   :  { %v384_v36 = vpop.f32.mrf.mxu0  ;;  %v583_v42 = vpop.f32.mrf.mxu3 }
 0x197   :  { %v385_v37 = vadd.f32 %v2788_v32, %v384_v36  ;;  %v584_v44 = vadd.f32 %v2789_v35, %v583_v42  ;;  %v2717_v42 = vld [vmem:[%s3463_s29 + $0x30] sm:$0xff] }
 0x199   :  { %v388_v40 = vmax.f32 %v385_v37, 0.0  ;;  %v587_v45 = vmax.f32 %v584_v44, 0.0  ;;  %v2716_v44 = vld [vmem:[%s3463_s29 + $0x28] sm:$0xff] }
 0x19b   :  { %v389_v41 = vpack.c.bf16 %v388_v40, %v387_v38  ;;  %v588_v46 = vpack.c.bf16 %v587_v45, %v586_v43  ;;  %v2689_v38 = vld [vmem:[%s3955_s5 + $0x38] sm:$0xff]  ;;  %v2686_v43 = vld [vmem:[%s3955_s5 + $0x20] sm:$0xff] }
 0x19c   :  { %906 = vmatpush.bf16.msra.mxu0 %v2689_v38  ;;  %v2718_v40 = vld [vmem:[%s3463_s29 + $0x38] sm:$0xff] }
 0x19d   :  { %466 = vmatmul.bf16.vlgmr.msra.gmra.mxu1 %v389_v41  ;;  %665 = vmatmul.bf16.vlgmr.msrb.gmra.mxu0 %v588_v46  ;;  %v2687_v41 = vld [vmem:[%s3955_s5 + $0x28] sm:$0xff]  ;;  %v2685_v45 = vld [vmem:[%s3955_s5 + $0x18] sm:$0xff] }
 0x19e   :  { %1047 = vmatpush.bf16.msra.mxu1 %v2702_v16  ;;  %v2710_v46 = vld [vmem:[%s3956_s26 + $0x38] sm:$0xff] }
 0x1a0   :  { %907 = vmatpush.bf16.msra.mxu0 %v2688_v39 }
 0x1a2   :  { %1048 = vmatpush.bf16.msra.mxu1 %v2701_v17 }
 0x1a4   :  { %908 = vmatpush.bf16.msra.mxu0 %v2687_v41 }
 0x1a6   :  { %1049 = vmatpush.bf16.msra.mxu1 %v2700_v18 }
 0x1a8   :  { %909 = vmatpush.bf16.msra.mxu0 %v2686_v43 }
 0x1aa   :  { %1050 = vmatpush.bf16.msra.mxu1 %v2699_v19 }
 0x1ac   :  { %910 = vmatpush.bf16.msra.mxu0 %v2685_v45 }
 0x1b0   :  { %911 = vmatpush.bf16.msra.mxu0 %v2684_v48 }
 0x1b4   :  { %912 = vmatpush.bf16.msra.mxu0 %v2683_v51 }
 0x1b8   :  { %913 = vmatpush.bf16.msra.mxu0 %v2682_v54 }
 0x21a   :  { %v467_v58 = vpop.f32.mrf.mxu1  ;;  %v666_v60 = vpop.f32.mrf.mxu0 }
 0x21b   :  { %v468_v61 = vadd.f32 %v2790_v59, %v467_v58  ;;  %v667_v3 = vadd.f32 %v2791_v63, %v666_v60  ;;  %v2711_v58 = vld [vmem:[%s3463_s29] sm:$0xff]  ;;  %s3958_s29 = sld [smem:[#allocation50_spill]] }
 0x21d   :  { %v472_v1 = vmax.f32 %v468_v61, 0.0  ;;  %v671_v9 = vmax.f32 %v667_v3, 0.0  ;;  %v2704_v61 = vld [vmem:[%s3956_s26 + $0x8] sm:$0xff] }
 0x221   :  { %v2695_v38 = vld [vmem:[%s3958_s29 + $0x28] sm:$0xff]  ;;  %v2694_v43 = vld [vmem:[%s3958_s29 + $0x20] sm:$0xff] }
 0x222   :  { %v469_v62 = vpop.f32.mrf.mxu1  ;;  %v668_v5 = vpop.f32.mrf.mxu0  ;;  %v2691_v54 = vld [vmem:[%s3958_s29 + $0x8] sm:$0xff] }
 0x223   :  { %v470_v0 = vadd.f32 %v2790_v59, %v469_v62  ;;  %v669_v8 = vadd.f32 %v2791_v63, %v668_v5  ;;  %v2705_v59 = vld [vmem:[%s3956_s26 + $0x10] sm:$0xff]  ;;  %v2703_v63 = vld [vmem:[%s3956_s26] sm:$0xff] }
 0x225   :  { %v473_v2 = vmax.f32 %v470_v0, 0.0  ;;  %v672_v10 = vmax.f32 %v669_v8, 0.0 }
 0x227   :  { %v474_v4 = vpack.c.bf16 %v473_v2, %v472_v1  ;;  %v673_v11 = vpack.c.bf16 %v672_v10, %v671_v9 }
 0x229   :  { %551 = vmatmul.bf16.vlgmr.msra.gmra.mxu2 %v474_v4  ;;  %750 = vmatmul.bf16.vlgmr.msrb.gmra.mxu3 %v673_v11 }
 0x22a   :  { %1070 = vmatpush.bf16.msra.mxu2 %v2698_v14 }
 0x239   :  { %2460 = vmatmul.msk.bf16.vlgmr.msrb.gmra.mxu2 %vm369_vm0, %v3545_v6  ;;  %v2792_v6 = vld [vmem:[#allocation11] ss:$0 sm:$0xff] }
 0x23a   :  { %1239 = vmatpush.bf16.msrb.mxu2 %v2718_v40 }
 0x23e   :  { %1240 = vmatpush.bf16.msrb.mxu2 %v2717_v42 }
 0x242   :  { %1241 = vmatpush.bf16.msrb.mxu2 %v2716_v44 }
 0x246   :  { %1242 = vmatpush.bf16.msrb.mxu2 %v2715_v47 }
 0x249   :  { %2546 = vmatmul.msk.bf16.vlgmr.msra.gmra.mxu2 %vm369_vm0, %v3547_v7 }
 0x24a   :  { %1243 = vmatpush.bf16.msrb.mxu2 %v2714_v50 }
 0x24e   :  { %1244 = vmatpush.bf16.msrb.mxu2 %v2713_v53  ;;  %v2692_v53 = vld [vmem:[%s3958_s29 + $0x10] sm:$0xff] }
 0x252   :  { %1245 = vmatpush.bf16.msrb.mxu2 %v2712_v56 }
 0x256   :  { %1246 = vmatpush.bf16.msrb.mxu2 %v2711_v58 }
 0x2ac   :  { %v552_v20 = vpop.f32.mrf.mxu2  ;;  %v751_v24 = vpop.f32.mrf.mxu3 }
 0x2ad   :  { %v3595_v21 = vadd.f32 %v2792_v6, %v552_v20  ;;  %v3603_v25 = vadd.f32 %v2793_v22, %v751_v24 }
 0x2af   :  { %1276 = vrot.lane.b32.xlu1 %v3595_v21, %s3298_s17  ;;  %v1534_v23 = vmul.f32 %v3595_v21, %v3595_v21  ;;  %v1720_v28 = vmul.f32 %v3603_v25, %v3603_v25 }
 0x2b1   :  { %v1535_v7 = vsel %vm791_vm1, %v1534_v23, 0.0  ;;  %v1721_v29 = vsel %vm791_vm1, %v1720_v28, 0.0  ;;  %v2795_v28 = vld [vmem:[#allocation23] ss:$0 sm:$0xff] }
 0x2b2   :  { %1536 = vadd.xlane.f32.xlu0 %v1535_v7  ;;  %1722 = vadd.xlane.f32.xlu2 %v1721_v29  ;;  %v2697_v29 = vld [vmem:[%s3958_s29 + $0x38] sm:$0xff] }
 0x2b3   :  { %991 = vmatpush.bf16.msra.mxu3 %v2697_v29 }
 0x2b4   :  { %v554_v26 = vpop.f32.mrf.mxu2  ;;  %v753_v31 = vpop.f32.mrf.mxu3 }
 0x2b5   :  { %v3605_v27 = vadd.f32 %v2792_v6, %v554_v26  ;;  %v3615_v32 = vadd.f32 %v2793_v22, %v753_v31  ;;  %v2696_v31 = vld [vmem:[%s3958_s29 + $0x30] sm:$0xff] }
 0x2b7   :  { %1278 = vrot.lane.b32.xlu1 %v3605_v27, %s3298_s17  ;;  %v756_v30 = vpack.c.bf16 %v3605_v27, %v3595_v21  ;;  %v2078_v33 = vmul.f32 %v3615_v32, %v3615_v32  ;;  %v1005_v35 = vpack.c.bf16 %v3615_v32, %v3603_v25  ;;  %v1900_v36 = vmul.f32 %v3605_v27, %v3605_v27 }
 0x2b8   :  { %992 = vmatpush.bf16.msra.mxu3 %v2696_v31 }
 0x2b9   :  { %2455 = vmatmul.msk.bf16.vlgmr.msrb.gmra.mxu1 %vm791_vm1, %v756_v30  ;;  %v2079_v34 = vsel %vm791_vm1, %v2078_v33, 0.0  ;;  %v1901_v37 = vsel %vm791_vm1, %v1900_v36, 0.0 }
 0x2ba   :  { %2080 = vadd.xlane.f32.xlu2 %v2079_v34  ;;  %1154 = vmatpush.bf16.msrb.mxu1 %v2710_v46 }
 0x2bc   :  { %v824_v62 = vpop.f32.mrf.mxu2  ;;  %993 = vmatpush.bf16.msra.mxu3 %v2695_v38 }
 0x2be   :  { %1155 = vmatpush.bf16.msrb.mxu1 %v2709_v49 }
 0x2c0   :  { %994 = vmatpush.bf16.msra.mxu3 %v2694_v43 }
 0x2c2   :  { %1156 = vmatpush.bf16.msrb.mxu1 %v2708_v52  ;;  %v2693_v52 = vld [vmem:[%s3958_s29 + $0x18] sm:$0xff] }
 0x2c4   :  { %v826_v3 = vpop.f32.mrf.mxu2  ;;  %995 = vmatpush.bf16.msra.mxu3 %v2693_v52 }
 0x2c6   :  { %1398 = vrot.lane.b32.xlu0 %v3603_v25, %s3298_s17  ;;  %1157 = vmatpush.bf16.msrb.mxu1 %v2707_v55  ;;  %v2690_v55 = vld [vmem:[%s3958_s29] sm:$0xff] }
 0x2c8   :  { %996 = vmatpush.bf16.msra.mxu3 %v2692_v53 }
 0x2c9   :  { %2541 = vmatmul.msk.bf16.vlgmr.msra.gmra.mxu1 %vm791_vm1, %v1005_v35 }
 0x2ca   :  { %1158 = vmatpush.bf16.msrb.mxu1 %v2706_v57  ;;  %v2796_v57 = vld [vmem:[#allocation17] ss:$0 sm:$0xff] }
 0x2cc   :  { %v1072_v6 = vpop.f32.mrf.mxu2  ;;  %997 = vmatpush.bf16.msra.mxu3 %v2691_v54 }
 0x2ce   :  { %1400 = vrot.lane.b32.xlu0 %v3615_v32, %s3298_s17  ;;  %s3957_s17 = sld [smem:[#allocation48_spill]]  ;;  %1159 = vmatpush.bf16.msrb.mxu1 %v2705_v59 }
 0x2d0   :  { %998 = vmatpush.bf16.msra.mxu3 %v2690_v55 }
 0x2d2   :  { %1160 = vmatpush.bf16.msrb.mxu1 %v2704_v61 }
 0x2d4   :  { %v2794_v5 = vld [vmem:[%s3957_s17] ss:$0 sm:$0xff]  ;;  %v1074_v33 = vpop.f32.mrf.mxu2 }
 0x2d6   :  { %1161 = vmatpush.bf16.msrb.mxu1 %v2703_v63 }
 0x2e1   :  { %1902 = vadd.xlane.f32.xlu1 %v1901_v37 }
 0x321   :  { %v3657_v16 = vpop.permute.xlu1 %1276 }
 0x325   :  { %v3652_v60 = vpop.xlane.xlu2 %1722 }
 0x329   :  { %v3661_v30 = vpop.permute.xlu1 %1278 }
 0x32d   :  { %v2081_v0 = vpop.xlane.xlu2 %2080 }
 0x32e   :  { %v2082_v1 = vadd.f32 1e-12, %v2081_v0 }
 0x330   :  { %2800 = vrsqrt.f32 %v2082_v1  ;;  %vm2089_vm3 = vweird.f32 %v2082_v1 }
 0x336   :  { %v804_v2 = vpop.f32.mrf.mxu1  ;;  %v2801_v8 = vpop.eup %2800 }
 0x337   :  { %v825_v4 = vadd.f32 %v824_v62, %v804_v2  ;;  %v2084_v9 = vmul.f32 %v2801_v8, %v2082_v1  ;;  %vm2090_vm2 = vweird.f32 %v2801_v8 }
 0x338   :  { %vm2091_vm4 = vmor %vm2089_vm3, %vm2090_vm2 }
 0x339   :  { %v2085_v11 = vmul.f32 %v2801_v8, %v2084_v9  ;;  %v833_v12 = vadd.f32 %v2794_v5, %v825_v4 }
 0x33b   :  { %v2086_v14 = vmul.f32 0.5, %v2085_v11  ;;  %v835_v18 = vmax.f32 %v833_v12, 0.0 }
 0x33d   :  { %v2087_v17 = vsub.f32 1.5, %v2086_v14 }
 0x33e   :  { %v806_v10 = vpop.f32.mrf.mxu1 }
 0x33f   :  { %v827_v13 = vadd.f32 %v826_v3, %v806_v10  ;;  %v2088_v20 = vmul.f32 %v2801_v8, %v2087_v17  ;;  %v2798_v10 = vld [vmem:[#allocation19] ss:$0 sm:$0xff] }
 0x341   :  { %v834_v15 = vadd.f32 %v2794_v5, %v827_v13  ;;  %v2092_v7 = vsel %vm2091_vm4, %v2801_v8, %v2088_v20 }
 0x342   :  { %v2093_v24 = vmul.f32 %v2092_v7, %v3615_v32  ;;  %v2799_v7 = vld [vmem:[#allocation26] ss:$0 sm:$0xff] }
 0x343   :  { %v836_v19 = vmax.f32 %v834_v15, 0.0 }
 0x344   :  { %2165 = vmatpush.msra.mxu2 %v2093_v24 }
 0x345   :  { %v837_v22 = vpack.c.bf16 %v836_v19, %v835_v18 }
 0x346   :  { %v1052_v23 = vpop.f32.mrf.mxu1 }
 0x347   :  { %914 = vmatmul.bf16.vlgmr.msra.gmra.mxu0 %v837_v22  ;;  %v1073_v26 = vadd.f32 %v1072_v6, %v1052_v23  ;;  %v1537_v6 = vpop.xlane.xlu0 %1536 }
 0x349   :  { %v1081_v35 = vadd.f32 %v2795_v28, %v1073_v26 }
 0x34b   :  { %v1083_v39 = vmax.f32 %v1081_v35, 0.0 }
 0x34e   :  { %v1054_v34 = vpop.f32.mrf.mxu1 }
 0x34f   :  { %v1075_v36 = vadd.f32 %v1074_v33, %v1054_v34 }
 0x351   :  { %v1082_v37 = vadd.f32 %v2795_v28, %v1075_v36  ;;  %v1399_v28 = vpop.permute.xlu0 %1398 }
 0x353   :  { %v1084_v40 = vmax.f32 %v1082_v37, 0.0 }
 0x354   :  { %v1903_v41 = vpop.xlane.xlu1 %1902 }
 0x355   :  { %v1085_v32 = vpack.c.bf16 %v1084_v40, %v1083_v39  ;;  %v1904_v42 = vadd.f32 1e-12, %v1903_v41  ;;  %v1538_v41 = vadd.f32 1e-12, %v1537_v6 }
 0x357   :  { %2802 = vrsqrt.f32 %v1904_v42  ;;  %1162 = vmatmul.bf16.vlgmr.msrb.gmra.mxu1 %v1085_v32  ;;  %vm1911_vm6 = vweird.f32 %v1904_v42  ;;  %vm1545_vm3 = vweird.f32 %v1538_v41 }
 0x358   :  { %2804 = vrsqrt.f32 %v1538_v41 }
 0x359   :  { %v1401_v36 = vpop.permute.xlu0 %1400 }
 0x35d   :  { %v2803_v44 = vpop.eup %2802 }
 0x35e   :  { %v1906_v45 = vmul.f32 %v2803_v44, %v1904_v42  ;;  %vm1912_vm5 = vweird.f32 %v2803_v44 }
 0x35f   :  { %vm1913_vm7 = vmor %vm1911_vm6, %vm1912_vm5 }
 0x360   :  { %v1907_v46 = vmul.f32 %v2803_v44, %v1906_v45  ;;  %v3717_v45 = vpop.eup %2804 }
 0x361   :  { %v1540_v52 = vmul.f32 %v3717_v45, %v1538_v41  ;;  %vm1546_vm14 = vweird.f32 %v3717_v45 }
 0x362   :  { %v1908_v47 = vmul.f32 0.5, %v1907_v46  ;;  %vm1547_vm5 = vmor %vm1545_vm3, %vm1546_vm14 }
 0x364   :  { %v1909_v48 = vsub.f32 1.5, %v1908_v47 }
 0x366   :  { %v1910_v49 = vmul.f32 %v2803_v44, %v1909_v48 }
 0x368   :  { %v1914_v50 = vsel %vm1913_vm7, %v2803_v44, %v1910_v49 }
 0x369   :  { %v1915_v51 = vmul.f32 %v1914_v50, %v3605_v27  ;;  %v2797_v27 = vld [vmem:[#allocation25] ss:$0 sm:$0xff] }
 0x36b   :  { %1987 = vmatpush.msra.mxu1 %v1915_v51 }
 0x3c4   :  { %v915_v56 = vpop.f32.mrf.mxu0 }
 0x3c5   :  { %v916_v58 = vadd.f32 %v2796_v57, %v915_v56 }
 0x3c7   :  { %v920_v62 = vmax.f32 %v916_v58, 0.0 }
 0x3cc   :  { %v917_v59 = vpop.f32.mrf.mxu0 }
 0x3cd   :  { %v918_v61 = vadd.f32 %v2796_v57, %v917_v59  ;;  %v1541_v57 = vmul.f32 %v3717_v45, %v1540_v52 }
 0x3cf   :  { %v921_v63 = vmax.f32 %v918_v61, 0.0 }
 0x3d1   :  { %v922_v0 = vpack.c.bf16 %v921_v63, %v920_v62 }
 0x3d3   :  { %999 = vmatmul.bf16.vlgmr.msra.gmra.mxu3 %v922_v0 }
 0x3d4   :  { %v1163_v1 = vpop.f32.mrf.mxu1 }
 0x3d5   :  { %v1164_v2 = vadd.f32 %v2797_v27, %v1163_v1  ;;  %v1542_v1 = vmul.f32 0.5, %v1541_v57 }
 0x3d7   :  { %v1168_v5 = vmax.f32 %v1164_v2, 0.0 }
 0x3dc   :  { %v1165_v3 = vpop.f32.mrf.mxu1 }
 0x3dd   :  { %v1166_v4 = vadd.f32 %v2797_v27, %v1165_v3  ;;  %v3724_v27 = vadd.f32 1e-12, %v3652_v60 }
 0x3df   :  { %v1169_v8 = vmax.f32 %v1166_v4, 0.0 }
 0x3e1   :  { %v1170_v9 = vpack.c.bf16 %v1169_v8, %v1168_v5 }
 0x3e3   :  { %1247 = vmatmul.bf16.vlgmr.msrb.gmra.mxu2 %v1170_v9 }
 0x456   :  { %v1000_v11 = vpop.f32.mrf.mxu3 }
 0x457   :  { %v3671_v12 = vadd.f32 %v2798_v10, %v1000_v11 }
 0x459   :  { %v1518_v13 = vmul.f32 %v3671_v12, %v3671_v12  ;;  %v3678_v14 = vsel %vm791_vm1, %v3671_v12, %v3657_v16 }
 0x45a   :  { %v1284_v15 = vmul.f32 %v3678_v14, %v3678_v14 }
 0x45b   :  { %v1519_v17 = vsel %vm791_vm1, %v1518_v13, 0.0 }
 0x45c   :  { %1520 = vadd.xlane.f32.xlu2 %v1519_v17  ;;  %1286 = vadd.xlane.f32.xlu1 %v1284_v15 }
 0x45e   :  { %v1002_v18 = vpop.f32.mrf.mxu3 }
 0x45f   :  { %v3683_v19 = vadd.f32 %v2798_v10, %v1002_v18  ;;  %v1543_v10 = vsub.f32 1.5, %v1542_v1 }
 0x461   :  { %v3688_v20 = vsel %vm791_vm1, %v3683_v19, %v3661_v30  ;;  %v1884_v16 = vmul.f32 %v3683_v19, %v3683_v19  ;;  %v1544_v18 = vmul.f32 %v3717_v45, %v1543_v10 }
 0x462   :  { %v1285_v22 = vmul.f32 %v3688_v20, %v3688_v20 }
 0x463   :  { %v1885_v23 = vsel %vm791_vm1, %v1884_v16, 0.0 }
 0x464   :  { %1288 = vadd.xlane.f32.xlu0 %v1285_v22  ;;  %1886 = vadd.xlane.f32.xlu2 %v1885_v23 }
 0x466   :  { %v1248_v24 = vpop.f32.mrf.mxu2 }
 0x467   :  { %v3695_v26 = vadd.f32 %v2799_v7, %v1248_v24 }
 0x469   :  { %v3699_v29 = vsel %vm791_vm1, %v3695_v26, %v1399_v28  ;;  %v1704_v31 = vmul.f32 %v3695_v26, %v3695_v26 }
 0x46a   :  { %v1406_v30 = vmul.f32 %v3699_v29, %v3699_v29 }
 0x46b   :  { %v1705_v35 = vsel %vm791_vm1, %v1704_v31, 0.0 }
 0x46c   :  { %1408 = vadd.xlane.f32.xlu2 %v1406_v30 }
 0x46e   :  { %v1250_v33 = vpop.f32.mrf.mxu2 }
 0x46f   :  { %v3705_v34 = vadd.f32 %v2799_v7, %v1250_v33  ;;  %v1548_v7 = vsel %vm1547_vm5, %v3717_v45, %v1544_v18 }
 0x471   :  { %v3710_v37 = vsel %vm791_vm1, %v3705_v34, %v1401_v36  ;;  %v2062_v39 = vmul.f32 %v3705_v34, %v3705_v34 }
 0x472   :  { %v1407_v38 = vmul.f32 %v3710_v37, %v3710_v37 }
 0x473   :  { %v2063_v40 = vsel %vm791_vm1, %v2062_v39, 0.0 }
 0x474   :  { %1706 = vadd.xlane.f32.xlu2 %v1705_v35 }
 0x47c   :  { %1410 = vadd.xlane.f32.xlu2 %v1407_v38 }
 0x484   :  { %2064 = vadd.xlane.f32.xlu2 %v2063_v40 }
 0x4cf   :  { %v1521_v32 = vpop.xlane.xlu2 %1520  ;;  %v1287_v42 = vpop.xlane.xlu1 %1286 }
 0x4d0   :  { %v1522_v43 = vadd.f32 1e-12, %v1521_v32  ;;  %v1290_v44 = vadd.f32 1e-12, %v1287_v42 }
 0x4d2   :  { %2806 = vrsqrt.f32 %v1522_v43  ;;  %vm1529_vm9 = vweird.f32 %v1522_v43  ;;  %vm1298_vm2 = vweird.f32 %v1290_v44 }
 0x4d3   :  { %2808 = vrsqrt.f32 %v1290_v44 }
 0x4d7   :  { %v1289_v46 = vpop.xlane.xlu0 %1288  ;;  %v3719_v47 = vpop.xlane.xlu2 %1886 }
 0x4d8   :  { %v2807_v48 = vpop.eup %2806  ;;  %v1291_v49 = vadd.f32 1e-12, %v1289_v46 }
 0x4d9   :  { %v2809_v50 = vpop.eup %2808  ;;  %v1524_v51 = vmul.f32 %v2807_v48, %v1522_v43  ;;  %vm1530_vm8 = vweird.f32 %v2807_v48 }
 0x4da   :  { %v1293_v53 = vmul.f32 %v2809_v50, %v1290_v44  ;;  %2810 = vrsqrt.f32 %v1291_v49  ;;  %vm1531_vm10 = vmor %vm1529_vm9, %vm1530_vm8  ;;  %vm1299_vm12 = vweird.f32 %v2809_v50  ;;  %vm1308_vm13 = vweird.f32 %v1291_v49 }
 0x4db   :  { %v1525_v54 = vmul.f32 %v2807_v48, %v1524_v51  ;;  %2812 = vrsqrt.f32 %v3724_v27  ;;  %vm1300_vm4 = vmor %vm1298_vm2, %vm1299_vm12 }
 0x4dc   :  { %v1294_v56 = vmul.f32 %v2809_v50, %v1293_v53 }
 0x4dd   :  { %v1526_v55 = vmul.f32 0.5, %v1525_v54 }
 0x4de   :  { %v1295_v62 = vmul.f32 0.5, %v1294_v56 }
 0x4df   :  { %v1527_v58 = vsub.f32 1.5, %v1526_v55  ;;  %v1409_v59 = vpop.xlane.xlu2 %1408 }
 0x4e0   :  { %v2811_v61 = vpop.eup %2810  ;;  %v3726_v4 = vadd.f32 1e-12, %v1409_v59  ;;  %v1296_v8 = vsub.f32 1.5, %v1295_v62 }
 0x4e1   :  { %v1303_v63 = vmul.f32 %v2811_v61, %v1291_v49  ;;  %v1528_v0 = vmul.f32 %v2807_v48, %v1527_v58  ;;  %vm1309_vm11 = vweird.f32 %v2811_v61  ;;  %v3734_v16 = vpop.eup %2812 }
 0x4e2   :  { %2814 = vrsqrt.f32 %v3726_v4  ;;  %v1297_v17 = vmul.f32 %v2809_v50, %v1296_v8  ;;  %vm1310_vm15 = vmor %vm1308_vm13, %vm1309_vm11  ;;  %v1726_v36 = vmul.f32 %v3734_v16, %v3724_v27  ;;  %vm1732_vm12 = vweird.f32 %v3734_v16 }
 0x4e3   :  { %v1304_v2 = vmul.f32 %v2811_v61, %v1303_v63  ;;  %v1532_v3 = vsel %vm1531_vm10, %v2807_v48, %v1528_v0  ;;  %vm1420_vm14 = vweird.f32 %v3726_v4  ;;  %v1253_v8 = vlaneseq }
 0x4e4   :  { %v1533_v5 = vmul.f32 %v1532_v3, %v3671_v12  ;;  %v1301_v22 = vsel %vm1300_vm4, %v2809_v50, %v1297_v17  ;;  %v1727_v41 = vmul.f32 %v3734_v16, %v1726_v36 }
 0x4e5   :  { %v1305_v9 = vmul.f32 0.5, %v1304_v2  ;;  %v1312_v31 = vmul.f32 %v1301_v22, %v3678_v14  ;;  %v3760_v10 = vshrl.u32 %v1253_v8, 7 }
 0x4e6   :  { %1550 = vxpose.xlu2.b32.start.end [1/1] (short) (narrow) %v1533_v5, 64  ;;  %v1728_v46 = vmul.f32 0.5, %v1727_v41 }
 0x4e7   :  { %v1306_v11 = vsub.f32 1.5, %v1305_v9  ;;  %v1707_v13 = vpop.xlane.xlu2 %1706 }
 0x4e8   :  { %v1708_v15 = vadd.f32 1e-12, %v1707_v13  ;;  %v3736_v23 = vpop.eup %2814  ;;  %v1729_v53 = vsub.f32 1.5, %v1728_v46  ;;  %v3310_v13 = vmov 0.0  }
 0x4e9   :  { %v1307_v60 = vmul.f32 %v2811_v61, %v1306_v11  ;;  %v1415_v33 = vmul.f32 %v3736_v23, %v3726_v4  ;;  %vm1421_vm10 = vweird.f32 %v3736_v23  ;;  %v3762_v11 = vand.u32 127, %v1253_v8 }
 0x4ea   :  { %2816 = vrsqrt.f32 %v1708_v15  ;;  %vm1715_vm7 = vweird.f32 %v1708_v15  ;;  %v1730_v59 = vmul.f32 %v3734_v16, %v1729_v53  ;;  %vm1422_vm2 = vmor %vm1420_vm14, %vm1421_vm10 }
 0x4eb   :  { %v1311_v12 = vsel %vm1310_vm15, %v2811_v61, %v1307_v60  ;;  %v1416_v39 = vmul.f32 %v3736_v23, %v1415_v33  ;;  %vm1731_vm15 = vweird.f32 %v3724_v27  ;;  %v1888_v33 = vadd.f32 1e-12, %v3719_v47 }
 0x4ec   :  { %v1313_v6 = vmul.f32 %v1311_v12, %v3688_v20  ;;  %v1549_v20 = vmul.f32 %v1548_v7, %v3595_v21  ;;  %vm1733_vm3 = vmor %vm1731_vm15, %vm1732_vm12 }
 0x4ed   :  { %v1417_v44 = vmul.f32 0.5, %v1416_v39  ;;  %v1734_v1 = vsel %vm1733_vm3, %v3734_v16, %v1730_v59 }
 0x4ee   :  { %1328 = vmatpush.xpose.msrb.mxu0 %v1313_v6  ;;  %v1735_v4 = vmul.f32 %v1734_v1, %v3603_v25 }
 0x4ef   :  { %v1411_v24 = vpop.xlane.xlu2 %1410  ;;  %v1418_v51 = vsub.f32 1.5, %v1417_v44 }
 0x4f0   :  { %v2817_v28 = vpop.eup %2816  ;;  %v1413_v30 = vadd.f32 1e-12, %v1411_v24 }
 0x4f1   :  { %v1710_v35 = vmul.f32 %v2817_v28, %v1708_v15  ;;  %vm1716_vm6 = vweird.f32 %v2817_v28  ;;  %v1419_v58 = vmul.f32 %v3736_v23, %v1418_v51 }
 0x4f2   :  { %2818 = vrsqrt.f32 %v1413_v30  ;;  %1329 = vmatpush.xpose.msrb.mxu0 %v1312_v31  ;;  %vm1717_vm8 = vmor %vm1715_vm7, %vm1716_vm6  ;;  %vm1430_vm11 = vweird.f32 %v1413_v30  ;;  %vm1582_vm7 = vcmask 64512  }
 0x4f3   :  { %v1711_v38 = vmul.f32 %v2817_v28, %v1710_v35  ;;  %v1423_v0 = vsel %vm1422_vm2, %v3736_v23, %v1419_v58 }
 0x4f4   :  { %v1434_v3 = vmul.f32 %v1423_v0, %v3699_v29 }
 0x4f5   :  { %v1712_v40 = vmul.f32 0.5, %v1711_v38  ;;  %1330 = vmatmul.f32.vlgmr.msrb.gmra.mxu0 %v1312_v31 }
 0x4f6   :  { %1622 = vmatpush.msra.mxu0 %v1549_v20 }
 0x4f7   :  { %v1713_v14 = vsub.f32 1.5, %v1712_v40  ;;  %v2065_v32 = vpop.xlane.xlu2 %2064 }
 0x4f8   :  { %v2819_v42 = vpop.eup %2818  ;;  %v2066_v43 = vadd.f32 1e-12, %v2065_v32 }
 0x4f9   :  { %v1425_v21 = vmul.f32 %v2819_v42, %v1413_v30  ;;  %v1714_v45 = vmul.f32 %v2817_v28, %v1713_v14  ;;  %vm1431_vm9 = vweird.f32 %v2819_v42 }
 0x4fa   :  { %2820 = vrsqrt.f32 %v2066_v43  ;;  %vm1432_vm13 = vmor %vm1430_vm11, %vm1431_vm9  ;;  %vm2073_vm5 = vweird.f32 %v2066_v43  ;;  %vm1895_vm11 = vweird.f32 %v1888_v33 }
 0x4fb   :  { %v1426_v48 = vmul.f32 %v2819_v42, %v1425_v21  ;;  %v1718_v49 = vsel %vm1717_vm8, %v2817_v28, %v1714_v45  ;;  %vm1258_vm8 = vcmp.eq.s32.totalorder %v3760_v10, %v3762_v11  ;;  %2822 = vrsqrt.f32 %v1888_v33 }
 0x4fc   :  { %v1719_v50 = vmul.f32 %v1718_v49, %v3695_v26 }
 0x4fd   :  { %v1427_v52 = vmul.f32 0.5, %v1426_v48  ;;  %1333 = vmatmul.f32.gmra.mxu0 %v1313_v6  ;;  %v1255_v6 = vadd.s32 8, %v3760_v10 }
 0x4fe   :  { %1736 = vxpose.xlu0.b32.start.end [1/1] (short) (narrow) %v1719_v50, 64 }
 0x4ff   :  { %v1428_v54 = vsub.f32 1.5, %v1427_v52  ;;  %vm1259_vm9 = vcmp.eq.s32.totalorder %v1255_v6, %v3762_v11 }
 0x500   :  { %v2821_v55 = vpop.eup %2820  ;;  %v3778_v23 = vsel %vm1259_vm9, -1e+09, %v3310_v13 }
 0x501   :  { %v1429_v56 = vmul.f32 %v2819_v42, %v1428_v54  ;;  %v2068_v57 = vmul.f32 %v2821_v55, %v2066_v43  ;;  %vm2074_vm4 = vweird.f32 %v2821_v55  ;;  %v2823_v38 = vpop.eup %2822  ;;  %v1263_v54 = vsub.s32 %v1255_v6, %v3762_v11 }
 0x502   :  { %vm2075_vm6 = vmor %vm2073_vm5, %vm2074_vm4  ;;  %v1890_v39 = vmul.f32 %v2823_v38, %v1888_v33  ;;  %vm1896_vm10 = vweird.f32 %v2823_v38  ;;  %vm1373_vm4 = vcmask 7168  }
 0x503   :  { %v1433_v26 = vsel %vm1432_vm13, %v2819_v42, %v1429_v56  ;;  %v2069_v61 = vmul.f32 %v2821_v55, %v2068_v57  ;;  %vm1897_vm12 = vmor %vm1895_vm11, %vm1896_vm10  ;;  %v1268_v56 = vsub.s32 0, %v1263_v54  ;;  %vm1267_vm13 = vcmp.lt.s32.totalorder %v1263_v54, 0 }
 0x504   :  { %v1435_v62 = vmul.f32 %v1433_v26, %v3710_v37  ;;  %v1891_v14 = vmul.f32 %v2823_v38, %v1890_v39 }
 0x505   :  { %v2070_v63 = vmul.f32 0.5, %v2069_v61  ;;  %v1269_v59 = vsel %vm1267_vm13, %v1268_v56, %v1263_v54 }
 0x506   :  { %1450 = vmatpush.xpose.msrb.mxu3 %v1435_v62  ;;  %v1892_v47 = vmul.f32 0.5, %v1891_v14  ;;  %vm1271_vm14 = vcmp.eq.s32.totalorder %v1269_v59, 8 }
 0x507   :  { %v2071_v2 = vsub.f32 1.5, %v2070_v63 }
 0x508   :  { %v1893_v42 = vsub.f32 1.5, %v1892_v47 }
 0x509   :  { %v2072_v5 = vmul.f32 %v2821_v55, %v2071_v2 }
 0x50a   :  { %1451 = vmatpush.xpose.msrb.mxu3 %v1434_v3  ;;  %v1894_v43 = vmul.f32 %v2823_v38, %v1893_v42 }
 0x50b   :  { %v2076_v27 = vsel %vm2075_vm6, %v2821_v55, %v2072_v5 }
 0x50c   :  { %v2077_v37 = vmul.f32 %v2076_v27, %v3705_v34  ;;  %v3768_v34 = vsel %vm1258_vm8, -1e+09, %v3310_v13  ;;  %v1898_v21 = vsel %vm1897_vm12, %v2823_v38, %v1894_v43 }
 0x50d   :  { %1452 = vmatmul.f32.vlgmr.msrb.gmra.mxu3 %v1434_v3  ;;  %v1899_v45 = vmul.f32 %v1898_v21, %v3683_v19 }
 0x50e   :  { %1807 = vmatpush.msra.mxu3 %v1735_v4  ;;  %2094 = vxpose.xlu1.b32.start.end [1/1] (short) (narrow) %v2077_v37, 64 }
 0x515   :  { %1455 = vmatmul.f32.gmra.mxu3 %v1435_v62  ;;  %v3803_v62 = vsel %vm1271_vm14, 1.0, %v3310_v13 }
 0x572   :  { %v1331_v25 = vpop.f32.mrf.mxu0 }
 0x573   :  { %v1337_v29 = vmul.f32 14.285714, %v1331_v25 }
 0x575   :  { %v1339_v60 = vadd.f32 %v1337_v29, %v3768_v34 }
 0x577   :  { %v1341_v17 = vsel %vm369_vm0, %v1339_v60, -inf }
 0x57a   :  { %v1334_v16 = vpop.f32.mrf.mxu0 }
 0x57b   :  { %v1338_v22 = vmul.f32 14.285714, %v1334_v16  ;;  %v1262_v16 = vsub.s32 %v3760_v10, %v3762_v11 }
 0x57d   :  { %v1340_v24 = vadd.f32 %v1338_v22, %v3778_v23  ;;  %vm1264_vm15 = vcmp.lt.s32.totalorder %v1262_v16, 0 }
 0x57f   :  { %v1566_v9 = vpop.trf.xlu2  ;;  %v1344_v30 = vsel %vm369_vm0, %v1340_v24, -inf }
 0x580   :  { %2611 = vmatmul.msk.f32.vlgmr.msra.gmra.mxu0 %vm1582_vm7, %v1566_v9 }
 0x587   :  { %v1567_v15 = vpop.trf.xlu2 }
 0x588   :  { %2612 = vmatmul.msk.f32.gmra.mxu0 %vm1582_vm7, %v1567_v15 }
 0x58f   :  { %1342 = vmax.xlane.f32.xlu2 %v1341_v17  ;;  %v1568_v18 = vpop.trf.xlu2 }
 0x590   :  { %2613 = vmatmul.msk.f32.gmra.mxu0 %vm1582_vm7, %v1568_v18  ;;  %v1453_v58 = vpop.f32.mrf.mxu3 }
 0x591   :  { %v1459_v8 = vmul.f32 14.285714, %v1453_v58 }
 0x593   :  { %v3816_v15 = vadd.f32 %v1459_v8, %v3768_v34 }
 0x597   :  { %v1569_v12 = vpop.trf.xlu2 }
 0x598   :  { %2614 = vmatmul.msk.f32.gmra.mxu0 %vm1582_vm7, %v1569_v12  ;;  %v1456_v0 = vpop.f32.mrf.mxu3 }
 0x599   :  { %v1460_v3 = vmul.f32 14.285714, %v1456_v0 }
 0x59b   :  { %v3809_v27 = vadd.f32 %v1460_v3, %v3778_v23  ;;  %v1265_v23 = vsub.s32 0, %v1262_v16 }
 0x59d   :  { %v1466_v25 = vsel %vm369_vm0, %v3809_v27, -inf  ;;  %v1266_v34 = vsel %vm1264_vm15, %v1265_v23, %v1262_v16 }
 0x59e   :  { %vm1270_vm2 = vcmp.eq.s32.totalorder %v1266_v34, 8 }
 0x59f   :  { %v1570_v7 = vpop.trf.xlu2 }
 0x5a0   :  { %2615 = vmatmul.msk.f32.gmra.mxu0 %vm1582_vm7, %v1570_v7 }
 0x5a2   :  { %v1752_v28 = vpop.trf.xlu0 }
 0x5a3   :  { %2619 = vmatmul.msk.f32.vlgmr.msra.gmra.mxu3 %vm1582_vm7, %v1752_v28  ;;  %v3311_v28 = vmov 8.0  }
 0x5a7   :  { %1345 = vmax.xlane.f32.xlu0 %v1344_v30  ;;  %v1571_v31 = vpop.trf.xlu2  ;;  %v3825_v30 = vsel %vm1270_vm2, 1.0, %v3310_v13 }
 0x5a8   :  { %2616 = vmatmul.msk.f32.gmra.mxu0 %vm1582_vm7, %v1571_v31 }
 0x5aa   :  { %v1753_v35 = vpop.trf.xlu0 }
 0x5ab   :  { %2620 = vmatmul.msk.f32.gmra.mxu3 %vm1582_vm7, %v1753_v35 }
 0x5af   :  { %v1572_v20 = vpop.trf.xlu2 }
 0x5b0   :  { %2617 = vmatmul.msk.f32.gmra.mxu0 %vm1582_vm7, %v1572_v20 }
 0x5b2   :  { %v1754_v36 = vpop.trf.xlu0  ;;  %v2110_v49 = vpop.trf.xlu1 }
 0x5b3   :  { %2621 = vmatmul.msk.f32.gmra.mxu3 %vm1582_vm7, %v1754_v36  ;;  %2635 = vmatmul.msk.f32.vlgmr.msra.gmra.mxu2 %vm1582_vm7, %v2110_v49 }
 0x5b7   :  { %v1573_v40 = vpop.trf.xlu2 }
 0x5b8   :  { %2618 = vmatmul.msk.f32.gmra.mxu0 %vm1582_vm7, %v1573_v40 }
 0x5ba   :  { %v1755_v41 = vpop.trf.xlu0  ;;  %v2111_v53 = vpop.trf.xlu1 }
 0x5bb   :  { %2622 = vmatmul.msk.f32.gmra.mxu3 %vm1582_vm7, %v1755_v41  ;;  %2636 = vmatmul.msk.f32.gmra.mxu2 %vm1582_vm7, %v2111_v53 }
 0x5c2   :  { %v1756_v32 = vpop.trf.xlu0  ;;  %v2112_v57 = vpop.trf.xlu1 }
 0x5c3   :  { %2623 = vmatmul.msk.f32.gmra.mxu3 %vm1582_vm7, %v1756_v32  ;;  %2637 = vmatmul.msk.f32.gmra.mxu2 %vm1582_vm7, %v2112_v57 }
 0x5ca   :  { %v1757_v44 = vpop.trf.xlu0  ;;  %v2113_v26 = vpop.trf.xlu1 }
 0x5cb   :  { %2624 = vmatmul.msk.f32.gmra.mxu3 %vm1582_vm7, %v1757_v44  ;;  %2638 = vmatmul.msk.f32.gmra.mxu2 %vm1582_vm7, %v2113_v26 }
 0x5d0   :  { %1916 = vxpose.xlu0.b32.start.end [1/1] (short) (narrow) %v1899_v45, 64 }
 0x5d2   :  { %v1758_v46 = vpop.trf.xlu0  ;;  %v2114_v5 = vpop.trf.xlu1 }
 0x5d3   :  { %2625 = vmatmul.msk.f32.gmra.mxu3 %vm1582_vm7, %v1758_v46  ;;  %2639 = vmatmul.msk.f32.gmra.mxu2 %vm1582_vm7, %v2114_v5 }
 0x5da   :  { %v1759_v48 = vpop.trf.xlu0  ;;  %v2115_v29 = vpop.trf.xlu1 }
 0x5db   :  { %2626 = vmatmul.msk.f32.gmra.mxu3 %vm1582_vm7, %v1759_v48  ;;  %2640 = vmatmul.msk.f32.gmra.mxu2 %vm1582_vm7, %v2115_v29 }
 0x5e2   :  { %v2116_v17 = vpop.trf.xlu1 }
 0x5e3   :  { %2641 = vmatmul.msk.f32.gmra.mxu2 %vm1582_vm7, %v2116_v17 }
 0x5ea   :  { %v2117_v18 = vpop.trf.xlu1 }
 0x5eb   :  { %2642 = vmatmul.msk.f32.gmra.mxu2 %vm1582_vm7, %v2117_v18 }
 0x5fd   :  { %v1624_v6 = vpop.f32.mrf.mxu0 }
 0x602   :  { %v1343_v50 = vpop.xlane.xlu2 %1342 }
 0x603   :  { %v1347_v51 = vsub.f32 %v1339_v60, %v1343_v50  ;;  %v1463_v60 = vsel %vm369_vm0, %v3816_v15, -inf }
 0x605   :  { %v1349_v52 = vmul.f32 1.442695, %v1347_v51  ;;  %v1627_v7 = vpop.f32.mrf.mxu0  ;;  %v1363_v33 = vmul.f32 %v1347_v51, %v3825_v30 }
 0x607   :  { %2824 = vpow2.f32 %v1349_v52  ;;  %v1365_v11 = vsel %vm369_vm0, %v1363_v33, 0.0 }
 0x60d   :  { %v2825_v19 = vpop.eup %2824  ;;  %v1630_v35 = vpop.f32.mrf.mxu0 }
 0x60e   :  { %v1353_v55 = vsel %vm369_vm0, %v2825_v19, 0.0 }
 0x60f   :  { %1354 = vadd.xlane.f32.xlu1 %v1353_v55 }
 0x615   :  { %v1633_v40 = vpop.f32.mrf.mxu0 }
 0x61a   :  { %v1346_v61 = vpop.xlane.xlu0 %1345 }
 0x61b   :  { %v1348_v63 = vsub.f32 %v1340_v24, %v1346_v61 }
 0x61d   :  { %v1351_v1 = vmul.f32 1.442695, %v1348_v63  ;;  %v1364_v2 = vmul.f32 %v1348_v63, %v3803_v62  ;;  %v1636_v42 = vpop.f32.mrf.mxu0 }
 0x61f   :  { %2826 = vpow2.f32 %v1351_v1  ;;  %v1368_v4 = vsel %vm369_vm0, %v1364_v2, 0.0 }
 0x620   :  { %1369 = vadd.xlane.f32.xlu1 %v1368_v4  ;;  %2828 = vrcp.f32 %v3311_v28 }
 0x625   :  { %v2827_v37 = vpop.eup %2826  ;;  %v1639_v57 = vpop.f32.mrf.mxu0 }
 0x626   :  { %v1356_v9 = vsel %vm369_vm0, %v2827_v37, 0.0  ;;  %v1809_v12 = vpop.f32.mrf.mxu3  ;;  %v2829_v20 = vpop.eup %2828 }
 0x627   :  { %1357 = vadd.xlane.f32.xlu2 %v1356_v9  ;;  %v1649_v36 = vmul.f32 8.0, %v2829_v20  ;;  %vm1653_vm3 = vweird.f32 %v2829_v20 }
 0x628   :  { %1467 = vmax.xlane.f32.xlu1 %v1466_v25 }
 0x629   :  { %v1650_v39 = vsub.f32 1.0, %v1649_v36 }
 0x62b   :  { %v1651_v41 = vmul.f32 %v2829_v20, %v1650_v39 }
 0x62d   :  { %v1652_v47 = vadd.f32 %v2829_v20, %v1651_v41 }
 0x62e   :  { %v1812_v22 = vpop.f32.mrf.mxu3 }
 0x62f   :  { %1464 = vmax.xlane.f32.xlu2 %v1463_v60  ;;  %v3832_v32 = vsel %vm1653_vm3, %v2829_v20, %v1652_v47 }
 0x630   :  { %v1833_v43 = vmul.f32 %v1809_v12, %v3832_v32  ;;  %v1834_v44 = vmul.f32 %v1812_v22, %v3832_v32  ;;  %v1655_v51 = vmul.f32 %v3832_v32, %v1624_v6  ;;  %v1656_v52 = vmul.f32 %v3832_v32, %v1627_v7 }
 0x631   :  { %v1657_v61 = vmul.f32 %v3832_v32, %v1630_v35  ;;  %v1658_v4 = vmul.f32 %v3832_v32, %v1633_v40  ;;  %v1659_v23 = vmul.f32 %v3832_v32, %v1636_v42 }
 0x632   :  { %v1841_v48 = vmul.f32 %v1833_v43, %v1833_v43  ;;  %v1842_v49 = vmul.f32 %v1834_v44, %v1834_v44  ;;  %v1663_v59 = vmul.f32 %v1655_v51, %v1655_v51  ;;  %v1664_v26 = vmul.f32 %v1656_v52, %v1656_v52 }
 0x633   :  { %v1665_v8 = vmul.f32 %v1657_v61, %v1657_v61  ;;  %v1666_v22 = vmul.f32 %v1658_v4, %v1658_v4  ;;  %v1667_v36 = vmul.f32 %v1659_v23, %v1659_v23 }
 0x634   :  { %v1849_v53 = vsel %vm791_vm1, %v1841_v48, 0.0  ;;  %v1850_v54 = vsel %vm791_vm1, %v1842_v49, 0.0  ;;  %v1671_v5 = vsel %vm791_vm1, %v1663_v59, 0.0  ;;  %v1672_v37 = vsel %vm791_vm1, %v1664_v26, 0.0 }
 0x635   :  { %v1851_v63 = vadd.f32 %v1850_v54, %v1849_v53  ;;  %v1673_v16 = vadd.f32 %v1672_v37, %v1671_v5  ;;  %v1674_v34 = vsel %vm791_vm1, %v1665_v8, 0.0 }
 0x636   :  { %v1815_v24 = vpop.f32.mrf.mxu3 }
 0x637   :  { %v1835_v50 = vmul.f32 %v1815_v24, %v3832_v32  ;;  %v1642_v24 = vpop.f32.mrf.mxu0 }
 0x638   :  { %v1661_v52 = vmul.f32 %v3832_v32, %v1642_v24 }
 0x639   :  { %v1843_v19 = vmul.f32 %v1835_v50, %v1835_v50 }
 0x63a   :  { %v1669_v59 = vmul.f32 %v1661_v52, %v1661_v52 }
 0x63b   :  { %v1852_v1 = vsel %vm791_vm1, %v1843_v19, 0.0 }
 0x63c   :  { %v1853_v9 = vadd.f32 %v1852_v1, %v1851_v63  ;;  %v1682_v5 = vsel %vm791_vm1, %v1669_v59, 0.0 }
 0x63e   :  { %v1818_v10 = vpop.f32.mrf.mxu3 }
 0x63f   :  { %v1836_v55 = vmul.f32 %v1818_v10, %v3832_v32  ;;  %v1675_v10 = vadd.f32 %v1674_v34, %v1673_v16 }
 0x641   :  { %v1844_v2 = vmul.f32 %v1836_v55, %v1836_v55 }
 0x643   :  { %v1854_v29 = vsel %vm791_vm1, %v1844_v2, 0.0 }
 0x644   :  { %v1855_v7 = vadd.f32 %v1854_v29, %v1853_v9  ;;  %v2167_v29 = vpop.f32.mrf.mxu2 }
 0x646   :  { %v1821_v13 = vpop.f32.mrf.mxu3 }
 0x647   :  { %v1837_v3 = vmul.f32 %v1821_v13, %v3832_v32 }
 0x649   :  { %v1845_v60 = vmul.f32 %v1837_v3, %v1837_v3 }
 0x64b   :  { %v1856_v33 = vsel %vm791_vm1, %v1845_v60, 0.0 }
 0x64c   :  { %v1857_v39 = vadd.f32 %v1856_v33, %v1855_v7 }
 0x64e   :  { %v1824_v45 = vpop.f32.mrf.mxu3 }
 0x64f   :  { %v1838_v17 = vmul.f32 %v1824_v45, %v3832_v32 }
 0x651   :  { %v1846_v35 = vmul.f32 %v1838_v17, %v1838_v17 }
 0x656   :  { %v1827_v0 = vpop.f32.mrf.mxu3 }
 0x657   :  { %v1839_v28 = vmul.f32 %v1827_v0, %v3832_v32 }
 0x659   :  { %v1847_v40 = vmul.f32 %v1839_v28, %v1839_v28 }
 0x65b   :  { %v1860_v54 = vsel %vm791_vm1, %v1847_v40, 0.0 }
 0x65e   :  { %v1830_v20 = vpop.f32.mrf.mxu3 }
 0x65f   :  { %v1840_v47 = vmul.f32 %v1830_v20, %v3832_v32  ;;  %v2191_v20 = vmul.f32 %v2167_v29, %v3832_v32 }
 0x661   :  { %v1848_v19 = vmul.f32 %v1840_v47, %v1840_v47 }
 0x663   :  { %v1862_v61 = vsel %vm791_vm1, %v1848_v19, 0.0 }
 0x674   :  { %v1932_v31 = vpop.trf.xlu0 }
 0x675   :  { %2627 = vmatmul.msk.f32.vlgmr.msra.gmra.mxu1 %vm1582_vm7, %v1932_v31 }
 0x679   :  { %1366 = vadd.xlane.f32.xlu0 %v1365_v11  ;;  %v1676_v11 = vsel %vm791_vm1, %v1666_v22, 0.0 }
 0x67a   :  { %v1677_v45 = vadd.f32 %v1676_v11, %v1675_v10  ;;  %v2199_v11 = vmul.f32 %v2191_v20, %v2191_v20 }
 0x67c   :  { %v1933_v38 = vpop.trf.xlu0 }
 0x67d   :  { %2628 = vmatmul.msk.f32.gmra.mxu1 %vm1582_vm7, %v1933_v38  ;;  %v1660_v38 = vmul.f32 %v3832_v32, %v1639_v57 }
 0x67f   :  { %v1668_v51 = vmul.f32 %v1660_v38, %v1660_v38 }
 0x682   :  { %v3836_v21 = vpop.xlane.xlu1 %1354 }
 0x684   :  { %v1934_v14 = vpop.trf.xlu0 }
 0x685   :  { %2629 = vmatmul.msk.f32.gmra.mxu1 %vm1582_vm7, %v1934_v14  ;;  %v1858_v14 = vsel %vm791_vm1, %v1846_v35, 0.0 }
 0x686   :  { %v1859_v53 = vadd.f32 %v1858_v14, %v1857_v39 }
 0x68c   :  { %v1935_v46 = vpop.trf.xlu0 }
 0x68d   :  { %2630 = vmatmul.msk.f32.gmra.mxu1 %vm1582_vm7, %v1935_v46  ;;  %v1678_v46 = vsel %vm791_vm1, %v1667_v36, 0.0 }
 0x68e   :  { %v1679_v57 = vadd.f32 %v1678_v46, %v1677_v45 }
 0x693   :  { %v3845_v56 = vpop.xlane.xlu1 %1369 }
 0x694   :  { %v1936_v58 = vpop.trf.xlu0 }
 0x695   :  { %2631 = vmatmul.msk.f32.gmra.mxu1 %vm1582_vm7, %v1936_v58  ;;  %v1680_v58 = vsel %vm791_vm1, %v1668_v51, 0.0 }
 0x696   :  { %v1681_v2 = vadd.f32 %v1680_v58, %v1679_v57 }
 0x698   :  { %v1683_v9 = vadd.f32 %v1682_v5, %v1681_v2 }
 0x69a   :  { %v1358_v25 = vpop.xlane.xlu2 %1357 }
 0x69b   :  { %2830 = vlog2.f32 %v1358_v25  ;;  %v1468_v18 = vpop.xlane.xlu1 %1467 }
 0x69c   :  { %v1470_v12 = vsub.f32 %v3809_v27, %v1468_v18  ;;  %v1937_v6 = vpop.trf.xlu0 }
 0x69d   :  { %2632 = vmatmul.msk.f32.gmra.mxu1 %vm1582_vm7, %v1937_v6 }
 0x69e   :  { %v1473_v31 = vmul.f32 1.442695, %v1470_v12  ;;  %v1486_v63 = vmul.f32 %v1470_v12, %v3803_v62  ;;  %v2170_v12 = vpop.f32.mrf.mxu2 }
 0x6a0   :  { %2832 = vpow2.f32 %v1473_v31  ;;  %v1490_v8 = vsel %vm369_vm0, %v1486_v63, 0.0 }
 0x6a1   :  { %v2831_v27 = vpop.eup %2830 }
 0x6a2   :  { %v1362_v41 = vmul.f32 0.6931472, %v2831_v27  ;;  %v1465_v13 = vpop.xlane.xlu2 %1464  ;;  %v2192_v27 = vmul.f32 %v2170_v12, %v3832_v32 }
 0x6a3   :  { %v1469_v42 = vsub.f32 %v3816_v15, %v1465_v13  ;;  %v2207_v13 = vsel %vm791_vm1, %v2199_v11, 0.0 }
 0x6a4   :  { %v1372_v43 = vsub.f32 %v3845_v56, %v1362_v41  ;;  %v1938_v44 = vpop.trf.xlu0  ;;  %v1645_v56 = vpop.f32.mrf.mxu0  ;;  %v2200_v36 = vmul.f32 %v2192_v27, %v2192_v27 }
 0x6a5   :  { %v1471_v48 = vmul.f32 1.442695, %v1469_v42  ;;  %2633 = vmatmul.msk.f32.gmra.mxu1 %vm1582_vm7, %v1938_v44  ;;  %v1485_v49 = vmul.f32 %v1469_v42, %v3825_v30  ;;  %v1861_v30 = vadd.f32 %v1860_v54, %v1859_v53  ;;  %v1662_v26 = vmul.f32 %v3832_v32, %v1645_v56 }
 0x6a6   :  { %v2833_v50 = vpop.eup %2832  ;;  %v1375_v22 = vsel %vm1373_vm4, %v1372_v43, 0.0  ;;  %v2173_v7 = vpop.f32.mrf.mxu2  ;;  %v2208_v14 = vsel %vm791_vm1, %v2200_v36, 0.0 }
 0x6a7   :  { %2834 = vpow2.f32 %v1471_v48  ;;  %v1487_v15 = vsel %vm369_vm0, %v1485_v49, 0.0  ;;  %v1478_v55 = vsel %vm369_vm0, %v2833_v50, 0.0  ;;  %v1863_v4 = vadd.f32 %v1862_v61, %v1861_v30 }
 0x6a8   :  { %1488 = vadd.xlane.f32.xlu2 %v1487_v15  ;;  %1479 = vadd.xlane.f32.xlu1 %v1478_v55  ;;  %v1670_v37 = vmul.f32 %v1662_v26, %v1662_v26  ;;  %2836 = vlog2.f32 %v3836_v21  ;;  %v2193_v38 = vmul.f32 %v2173_v7, %v3832_v32  ;;  %v2209_v49 = vadd.f32 %v2208_v14, %v2207_v13 }
 0x6aa   :  { %v1684_v25 = vsel %vm791_vm1, %v1670_v37, 0.0  ;;  %v2201_v47 = vmul.f32 %v2193_v38, %v2193_v38 }
 0x6ab   :  { %v1685_v62 = vadd.f32 %v1684_v25, %v1683_v9 }
 0x6ac   :  { %v1939_v0 = vpop.trf.xlu0  ;;  %v2210_v50 = vsel %vm791_vm1, %v2201_v47, 0.0 }
 0x6ad   :  { %v2835_v1 = vpop.eup %2834  ;;  %2634 = vmatmul.msk.f32.gmra.mxu1 %vm1582_vm7, %v1939_v0  ;;  %v2211_v58 = vadd.f32 %v2210_v50, %v2209_v49 }
 0x6ae   :  { %v1475_v3 = vsel %vm369_vm0, %v2835_v1, 0.0  ;;  %v2837_v60 = vpop.eup %2836  ;;  %v2176_v28 = vpop.f32.mrf.mxu2 }
 0x6af   :  { %1476 = vadd.xlane.f32.xlu0 %v1475_v3  ;;  %v1360_v17 = vmul.f32 0.6931472, %v2837_v60  ;;  %v2194_v44 = vmul.f32 %v2176_v28, %v3832_v32 }
 0x6b0   :  { %1864 = vadd.xlane.f32.xlu2 %v1863_v4  ;;  %1491 = vadd.xlane.f32.xlu1 %v1490_v8 }
 0x6b1   :  { %v2202_v54 = vmul.f32 %v2194_v44, %v2194_v44 }
 0x6b3   :  { %v2212_v2 = vsel %vm791_vm1, %v2202_v54, 0.0 }
 0x6b4   :  { %v2213_v25 = vadd.f32 %v2212_v2, %v2211_v58 }
 0x6b6   :  { %v2179_v21 = vpop.f32.mrf.mxu2 }
 0x6b7   :  { %v2195_v19 = vmul.f32 %v2179_v21, %v3832_v32 }
 0x6b8   :  { %1686 = vadd.xlane.f32.xlu1 %v1685_v62 }
 0x6b9   :  { %v2203_v3 = vmul.f32 %v2195_v19, %v2195_v19 }
 0x6be   :  { %v2182_v10 = vpop.f32.mrf.mxu2 }
 0x6bf   :  { %v2196_v30 = vmul.f32 %v2182_v10, %v3832_v32 }
 0x6c1   :  { %v2204_v62 = vmul.f32 %v2196_v30, %v2196_v30 }
 0x6c6   :  { %v2185_v51 = vpop.f32.mrf.mxu2 }
 0x6c7   :  { %v2197_v12 = vmul.f32 %v2185_v51, %v3832_v32 }
 0x6c9   :  { %v2205_v27 = vmul.f32 %v2197_v12, %v2197_v12 }
 0x6ec   :  { %v1367_v18 = vpop.xlane.xlu0 %1366 }
 0x6ed   :  { %v1371_v6 = vsub.f32 %v1367_v18, %v1360_v17  ;;  %v2214_v18 = vsel %vm791_vm1, %v2203_v3, 0.0 }
 0x6ef   :  { %v1374_v16 = vsel %vm1373_vm4, %v1371_v6, 0.0 }
 0x6f0   :  { %v1376_v23 = vadd.f32 %v1375_v22, %v1374_v16  ;;  %v2188_v22 = vpop.f32.mrf.mxu2 }
 0x6f1   :  { %v2198_v10 = vmul.f32 %v2188_v22, %v3832_v32 }
 0x6f2   :  { %v1989_v34 = vpop.f32.mrf.mxu1  ;;  %1377 = vadd.xlane.f32.xlu2 %v1376_v23 }
 0x6f3   :  { %v2013_v39 = vmul.f32 %v1989_v34, %v3832_v32 }
 0x6f5   :  { %v2021_v45 = vmul.f32 %v2013_v39, %v2013_v39 }
 0x6f7   :  { %v2029_v15 = vsel %vm791_vm1, %v2021_v45, 0.0 }
 0x6fa   :  { %v1992_v24 = vpop.f32.mrf.mxu1 }
 0x6fb   :  { %v2014_v40 = vmul.f32 %v1992_v24, %v3832_v32 }
 0x6fd   :  { %v2022_v46 = vmul.f32 %v2014_v40, %v2014_v40 }
 0x6ff   :  { %v2030_v55 = vsel %vm791_vm1, %v2022_v46, 0.0 }
 0x700   :  { %v2031_v4 = vadd.f32 %v2030_v55, %v2029_v15 }
 0x702   :  { %v1995_v31 = vpop.f32.mrf.mxu1 }
 0x703   :  { %v2015_v42 = vmul.f32 %v1995_v31, %v3832_v32  ;;  %v2215_v31 = vadd.f32 %v2214_v18, %v2213_v25 }
 0x705   :  { %v2023_v52 = vmul.f32 %v2015_v42, %v2015_v42  ;;  %v2218_v42 = vsel %vm791_vm1, %v2205_v27, 0.0 }
 0x707   :  { %v2032_v63 = vsel %vm791_vm1, %v2023_v52, 0.0 }
 0x708   :  { %v2033_v8 = vadd.f32 %v2032_v63, %v2031_v4 }
 0x70a   :  { %v1998_v33 = vpop.f32.mrf.mxu1 }
 0x70b   :  { %v2016_v48 = vmul.f32 %v1998_v33, %v3832_v32  ;;  %v2216_v33 = vsel %vm791_vm1, %v2204_v62, 0.0 }
 0x70c   :  { %v2217_v13 = vadd.f32 %v2216_v33, %v2215_v31 }
 0x70d   :  { %v2024_v56 = vmul.f32 %v2016_v48, %v2016_v48  ;;  %v3312_v48 = vmov 16.0  }
 0x70e   :  { %v2219_v45 = vadd.f32 %v2218_v42, %v2217_v13 }
 0x70f   :  { %v2034_v5 = vsel %vm791_vm1, %v2024_v56, 0.0 }
 0x710   :  { %v2035_v6 = vadd.f32 %v2034_v5, %v2033_v8 }
 0x712   :  { %v2001_v35 = vpop.f32.mrf.mxu1 }
 0x713   :  { %v2017_v53 = vmul.f32 %v2001_v35, %v3832_v32 }
 0x715   :  { %v2025_v0 = vmul.f32 %v2017_v53, %v2017_v53 }
 0x717   :  { %v2036_v29 = vsel %vm791_vm1, %v2025_v0, 0.0 }
 0x718   :  { %v2037_v34 = vadd.f32 %v2036_v29, %v2035_v6 }
 0x71a   :  { %v2004_v41 = vpop.f32.mrf.mxu1 }
 0x71b   :  { %v1480_v43 = vpop.xlane.xlu1 %1479  ;;  %v2018_v57 = vmul.f32 %v2004_v41, %v3832_v32  ;;  %v1489_v21 = vpop.xlane.xlu2 %1488 }
 0x71c   :  { %2838 = vlog2.f32 %v1480_v43  ;;  %v2206_v43 = vmul.f32 %v2198_v10, %v2198_v10 }
 0x71d   :  { %v2026_v37 = vmul.f32 %v2018_v57, %v2018_v57 }
 0x71f   :  { %v2038_v23 = vsel %vm791_vm1, %v2026_v37, 0.0 }
 0x720   :  { %v2039_v11 = vadd.f32 %v2038_v23, %v2037_v34 }
 0x722   :  { %v2007_v59 = vpop.f32.mrf.mxu1  ;;  %v1477_v26 = vpop.xlane.xlu0 %1476 }
 0x723   :  { %v2839_v61 = vpop.eup %2838  ;;  %v2019_v1 = vmul.f32 %v2007_v59, %v3832_v32  ;;  %2840 = vlog2.f32 %v1477_v26  ;;  %v1492_v17 = vpop.xlane.xlu1 %1491  ;;  %v3313_v26 = vmov 4096.0  }
 0x724   :  { %v1484_v9 = vmul.f32 0.6931472, %v2839_v61  ;;  %2842 = vrcp.f32 %v3312_v48  ;;  %v1865_v50 = vpop.xlane.xlu2 %1864 }
 0x725   :  { %v2027_v60 = vmul.f32 %v2019_v1, %v2019_v1  ;;  %2844 = vrcp.f32 %v3313_v26  ;;  %v1866_v1 = vrot.slane %v1865_v50, 4 }
 0x726   :  { %v1494_v24 = vsub.f32 %v1492_v17, %v1484_v9 }
 0x727   :  { %v2040_v35 = vsel %vm791_vm1, %v2027_v60, 0.0  ;;  %v1867_v4 = vadd.f32 %v1866_v1, %v1865_v50 }
 0x728   :  { %v1496_v40 = vsel %vm1373_vm4, %v1494_v24, 0.0  ;;  %v2041_v41 = vadd.f32 %v2040_v35, %v2039_v11 }
 0x729   :  { %v2841_v16 = vpop.eup %2840  ;;  %v1868_v62 = vrot.slane %v1867_v4, 2 }
 0x72a   :  { %v1482_v7 = vmul.f32 0.6931472, %v2841_v16  ;;  %v2010_v28 = vpop.f32.mrf.mxu1  ;;  %v2843_v49 = vpop.eup %2842 }
 0x72b   :  { %v2020_v20 = vmul.f32 %v2010_v28, %v3832_v32  ;;  %v2220_v32 = vsel %vm791_vm1, %v2206_v43, 0.0  ;;  %v1387_v51 = vmul.f32 16.0, %v2843_v49  ;;  %vm1391_vm0 = vweird.f32 %v2843_v49  ;;  %v1687_v61 = vpop.xlane.xlu1 %1686  ;;  %v2845_v0 = vpop.eup %2844 }
 0x72c   :  { %v1493_v36 = vsub.f32 %v1489_v21, %v1482_v7  ;;  %v2221_v46 = vadd.f32 %v2220_v32, %v2219_v45  ;;  %v1688_v63 = vrot.slane %v1687_v61, 4  ;;  %v1696_v3 = vmul.f32 4096.0, %v2845_v0 }
 0x72d   :  { %v2028_v38 = vmul.f32 %v2020_v20, %v2020_v20  ;;  %v1388_v52 = vsub.f32 1.0, %v1387_v51  ;;  %v1869_v22 = vadd.f32 %v1868_v62, %v1867_v4 }
 0x72e   :  { %v1495_v39 = vsel %vm1373_vm4, %v1493_v36, 0.0  ;;  %v1689_v2 = vadd.f32 %v1688_v63, %v1687_v61  ;;  %v1697_v8 = vsub.f32 1.0, %v1696_v3 }
 0x72f   :  { %v1497_v14 = vadd.f32 %v1496_v40, %v1495_v39  ;;  %v2042_v47 = vsel %vm791_vm1, %v2028_v38, 0.0  ;;  %v1389_v15 = vmul.f32 %v2843_v49, %v1388_v52  ;;  %vm1700_vm1 = vweird.f32 %v2845_v0 }
 0x730   :  { %v2043_v44 = vadd.f32 %v2042_v47, %v2041_v41  ;;  %v1690_v5 = vrot.slane %v1689_v2, 2  ;;  %v1698_v12 = vmul.f32 %v2845_v0, %v1697_v8  ;;  %v1870_v21 = vrot.slane %v1869_v22, 1 }
 0x731   :  { %1498 = vadd.xlane.f32.xlu2 %v1497_v14  ;;  %v1390_v57 = vadd.f32 %v2843_v49, %v1389_v15 }
 0x732   :  { %2044 = vadd.xlane.f32.xlu1 %v2043_v44  ;;  %v1691_v18 = vadd.f32 %v1690_v5, %v1689_v2  ;;  %v1699_v28 = vadd.f32 %v2845_v0, %v1698_v12  ;;  %v1871_v39 = vadd.f32 %v1870_v21, %v1869_v22 }
 0x733   :  { %v1392_v59 = vsel %vm1391_vm0, %v2843_v49, %v1390_v57 }
 0x734   :  { %v1692_v24 = vrot.slane %v1691_v18, 1  ;;  %v1701_v11 = vsel %vm1700_vm1, %v2845_v0, %v1699_v28 }
 0x736   :  { %v1693_v10 = vadd.f32 %v1692_v24, %v1691_v18 }
 0x739   :  { %2222 = vadd.xlane.f32.xlu2 %v2221_v46 }
 0x765   :  { %v1378_v53 = vpop.xlane.xlu2 %1377 }
 0x766   :  { %v1379_v54 = vrot.slane %v1378_v53, 4 }
 0x768   :  { %v1380_v19 = vadd.f32 %v1379_v54, %v1378_v53 }
 0x76a   :  { %v1381_v55 = vrot.slane %v1380_v19, 2 }
 0x76c   :  { %v1382_v56 = vadd.f32 %v1381_v55, %v1380_v19 }
 0x76e   :  { %v1383_v58 = vrot.slane %v1382_v56, 1 }
 0x770   :  { %v1384_v30 = vadd.f32 %v1383_v58, %v1382_v56 }
 0x772   :  { %2719 = vpush %v1384_v30 }
 0x773   :  { %2721 = vpush %v1392_v59 }
 0x7a3   :  { %s2720_s6 = spop %2719 }
 0x7a4   :  { %v1499_v37 = vpop.xlane.xlu2 %1498  ;;  %s2722_s28 = spop %2721 }
 0x7a5   :  { %v1500_v9 = vrot.slane %v1499_v37, 4  ;;  %v2045_v25 = vpop.xlane.xlu1 %2044  ;;  %s1394_s1 = smul.f32 %s2722_s28, %s2720_s6 }
 0x7a6   :  { %v2046_v29 = vrot.slane %v2045_v25, 4 }
 0x7a7   :  { %v1501_v60 = vadd.f32 %v1500_v9, %v1499_v37  ;;  %s1395_s25 = ssub.f32 0.0, %s1394_s1 }
 0x7a8   :  { %v2047_v17 = vadd.f32 %v2046_v29, %v2045_v25 }
 0x7a9   :  { %v1502_v6 = vrot.slane %v1501_v60, 2 }
 0x7aa   :  { %v2048_v16 = vrot.slane %v2047_v17, 2 }
 0x7ab   :  { %v1503_v23 = vadd.f32 %v1502_v6, %v1501_v60 }
 0x7ac   :  { %v2049_v34 = vadd.f32 %v2048_v16, %v2047_v17  ;;  %v2223_v7 = vpop.xlane.xlu2 %2222 }
 0x7ad   :  { %v2224_v31 = vrot.slane %v2223_v7, 4  ;;  %v1504_v33 = vrot.slane %v1503_v23, 1 }
 0x7ae   :  { %v2050_v35 = vrot.slane %v2049_v34, 1 }
 0x7af   :  { %v2225_v20 = vadd.f32 %v2224_v31, %v2223_v7  ;;  %v1505_v27 = vadd.f32 %v1504_v33, %v1503_v23 }
 0x7b0   :  { %v2051_v38 = vadd.f32 %v2050_v35, %v2049_v34 }
 0x7b1   :  { %v2226_v36 = vrot.slane %v2225_v20, 2  ;;  %2723 = vpush %v1505_v27 }
 0x7b2   :  { %2725 = vpush %v1693_v10 }
 0x7b3   :  { %v2227_v40 = vadd.f32 %v2226_v36, %v2225_v20  ;;  %2727 = vpush %v1701_v11 }
 0x7b4   :  { %2729 = vpush %v1871_v39 }
 0x7b5   :  { %2731 = vpush %v2051_v38  ;;  %v2228_v41 = vrot.slane %v2227_v40, 1 }
 0x7b7   :  { %v2229_v13 = vadd.f32 %v2228_v41, %v2227_v40 }
 0x7b9   :  { %2733 = vpush %v2229_v13 }
 0x7e2   :  { %s2724_s20 = spop %2723 }
 0x7e3   :  { %s1515_s7 = smul.f32 %s2724_s20, %s2722_s28  ;;  %s2726_s13 = spop %2725 }
 0x7e4   :  { %s2728_s14 = spop %2727 }
 0x7e5   :  { %s1516_s2 = ssub.f32 0.0, %s1515_s7  ;;  %s1703_s10 = smul.f32 %s2728_s14, %s2726_s13 }
 0x7e6   :  { %s2730_s12 = spop %2729 }
 0x7e7   :  { %s1517_s11 = sadd.f32 %s1516_s2, %s1395_s25  ;;  %s1881_s15 = smul.f32 %s2730_s12, %s2728_s14 }
 0x7e8   :  { %s2732_s0 = spop %2731 }
 0x7e9   :  { %2244 = sst [smem:[#allocation28]] %s1517_s11  ;;  %s2061_s3 = smul.f32 %s2732_s0, %s2728_s14 }
 0x7ea   :  { %s1882_s16 = sadd.f32 %s1881_s15, %s1703_s10  ;;  %s2734_s24 = spop %2733 }
 0x7eb   :  { %s2239_s21 = smul.f32 %s2734_s24, %s2728_s14 }
 0x7ec   :  { %s1883_s4 = smul.f32 0.5, %s1882_s16 }
 0x7ed   :  { %s2240_s30 = sadd.f32 %s2239_s21, %s2061_s3 }
 0x7ef   :  { %s2241_s9 = smul.f32 0.5, %s2240_s30 }
 0x7f1   :  { %s2242_s18 = sadd.f32 %s2241_s9, %s1883_s4 }
 0x7f3   :  { %2246 = sst [smem:[#allocation28 + $0x1]] %s2242_s18 }
 0x7f4   :  { %3241 = shalt.err (!%p3238_p0)
}
 0x7f5   :  { %s3314_s5 = smov [#allocation28]  }
 0x7f6   :  { %2255 = dma.smem_to_vmem %s3314_s5, 16, %s2253_s19, [#allocation4]  }
 0x7f7   :  { %3260 = dma.done.wait [#allocation4], 16  }
 0x7f8   :  { %3261 = vsyncadd [#allocation4], 4294967280 }
 0x7f9   :  { %2260 = sfence }
 0x7fa   :  { %2261 = vsyncpa [#allocation3], 1 }
 0x7fb   :  { %2262 = vsyncpa [#allocation6], 1 }
 0x7fc   :  { %2263 = vsyncpa [#allocation9], 1 }
 0x7fd   :  { %2264 = vsyncpa [#allocation12], 1 }
 0x7fe   :  { %2265 = vsyncpa [#allocation15], 1 }
 0x7ff   :  { %2266 = vsyncpa [#allocation18], 1 }
 0x800   :  { %2267 = vsyncpa [#allocation21], 1 }
 0x801   :  { %2268 = vsyncpa [#allocation24], 1 }
 0x802   :  { %2269 = vsyncpa [#allocation27], 1 }
 0x803   :  { %2270 = vsyncpa [#allocation4], 1 }

</bundles_post_ra>
